<compile_context>
chip_gen: v7x
topology: tpu7x:2x2x1
jax: 0.10.0
libtpu: 0.0.40
codegen_flags: <defaults>
</compile_context>

<pallas_src>
import jax
import jax.numpy as jnp
from jax.experimental import pallas as pl
from jax.experimental.pallas import tpu as pltpu  # noqa: F401  (TPU tuning hooks)


def _fc_lstm_kernel(xw_ref, wh_ref, wc_ref, h0_ref, c0_ref, out_ref):
    """Whole-sequence peephole-LSTM recurrence in a single invocation.

    Shapes seen by the kernel (all VMEM-resident, Hp = padded hidden = 128k):
      xw_ref : (T, B, 4*Hp)  precomputed x @ Wx^T + (bias_x + bias_h), T-major
      wh_ref : (Hp, 4*Hp)    fc_h weight, gate-block zero-padded, pre-transposed
      wc_ref : (3, Hp)       peephole weights stacked [W_ci; W_cf; W_co], padded
      h0_ref : (B, Hp)       initial hidden, zero-padded
      c0_ref : (B, Hp)       initial memory (broadcast to batch), zero-padded
      out_ref: (T*B, 2*Hp)   packed lane-dense output: [:, :Hp]=h, [:, Hp:]=c
    """
    T, B, G = xw_ref.shape
    Hp = h0_ref.shape[1]

    # Loop-invariant loads, hoisted once.
    wh = wh_ref[...]            # (Hp, 4*Hp)
    wc = wc_ref[...]            # (3, Hp)
    wci = wc[0:1, :]            # (1, Hp) -> broadcasts against (B, Hp)
    wcf = wc[1:2, :]
    wco = wc[2:3, :]

    h = h0_ref[...]             # (B, Hp) recurrent carries held as values
    c = c0_ref[...]

    # T is small and static: a fully-unrolled straight-line recurrence gives
    # the scheduler cross-step visibility (next step's MXU push overlaps this
    # step's EUP/VPU tail).
    for t in range(T):
        # Only the recurrent matmul remains on the per-step critical path;
        # xw_ref[t] is an aligned (B, 4*Hp) tile load (vld slots have slack).
        y = xw_ref[t] + jnp.dot(h, wh, preferred_element_type=jnp.float32)

        # Gate order matches torch.split(y, H, dim=1): i, f, o, g.
        # All slices are 128-lane aligned -> whole-vreg selects.
        i = jax.nn.sigmoid(y[:, 0 * Hp:1 * Hp] + wci * c)
        f = jax.nn.sigmoid(y[:, 1 * Hp:2 * Hp] + wcf * c)
        o_pre = y[:, 2 * Hp:3 * Hp]
        g = jnp.tanh(y[:, 3 * Hp:4 * Hp])

        c = f * c + i * g
        o = jax.nn.sigmoid(o_pre + wco * c)
        h = o * jnp.tanh(c)

        # Lane-dense packed stores (full 128-lane writes, no lane masking).
        out_ref[pl.ds(t * B, B), pl.ds(0, Hp)] = h
        out_ref[pl.ds(t * B, B), pl.ds(Hp, Hp)] = c


def fc_lstm_forward(x, init_hidden, init_memory, params):
    """x: (B, T, I); init_hidden: (B, H); init_memory: (H,) or (B, H).

    Returns (hiddens, memorys), each (T, B, H), matching FC_LSTM.forward.
    """
    B, T, I = x.shape
    H = init_hidden.shape[1]

    # Shape sanity (review correctness concern): gate dim must be exactly 4*H.
    assert params["fc_x_w"].shape == (4 * H, I), params["fc_x_w"].shape
    assert params["fc_h_w"].shape == (4 * H, H), params["fc_h_w"].shape
    assert params["fc_x_b"].shape == (4 * H,)
    assert params["fc_h_b"].shape == (4 * H,)

    # Pad hidden to a full lane width (multiple of 128) so each gate block is
    # a whole vreg in the lane dimension.
    Hp = max(128, -(-H // 128) * 128)
    pad_h = Hp - H

    def pad_gate_rows(w):
        # (4H, K) -> (4*Hp, K), zero rows appended within each gate block.
        k = w.shape[1]
        return jnp.pad(w.reshape(4, H, k), ((0, 0), (0, pad_h), (0, 0))).reshape(4 * Hp, k)

    # PyTorch Linear stores weights as (out, in); pre-transpose once.
    wx_pad = pad_gate_rows(params["fc_x_w"].astype(jnp.float32))          # (4Hp, I)
    wh_pad = pad_gate_rows(params["fc_h_w"].astype(jnp.float32))          # (4Hp, H)
    wh_pad = jnp.pad(wh_pad, ((0, 0), (0, pad_h)))                        # (4Hp, Hp)
    wx_t = wx_pad.T                                                       # (I, 4Hp)
    wh_t = wh_pad.T                                                       # (Hp, 4Hp)

    bias = (params["fc_x_b"] + params["fc_h_b"]).astype(jnp.float32)      # (4H,)
    bias_pad = jnp.pad(bias.reshape(4, H), ((0, 0), (0, pad_h))).reshape(4 * Hp)

    # Hoisted, non-recurrent input projection for ALL time steps as one
    # matmul, T-major so the kernel reads xw_ref[t] per step.
    x_tm = jnp.transpose(x.astype(jnp.float32), (1, 0, 2)).reshape(T * B, I)
    xw = (jnp.dot(x_tm, wx_t) + bias_pad).reshape(T, B, 4 * Hp)           # (T, B, 4Hp)

    # Peepholes stacked into a single small array, zero-padded.
    wc = jnp.stack(
        [params["W_ci"], params["W_cf"], params["W_co"]], axis=0
    ).astype(jnp.float32)                                                 # (3, H)
    wc_pad = jnp.pad(wc, ((0, 0), (0, pad_h)))                            # (3, Hp)

    h0 = jnp.pad(init_hidden.astype(jnp.float32), ((0, 0), (0, pad_h)))   # (B, Hp)
    # init_memory is documented as (H,); broadcasting upfront matches the
    # in-loop broadcast the PyTorch module performs.
    c0 = jnp.broadcast_to(init_memory.astype(jnp.float32), (B, H))
    c0 = jnp.pad(c0, ((0, 0), (0, pad_h)))                                # (B, Hp)

    packed = pl.pallas_call(
        _fc_lstm_kernel,
        out_shape=jax.ShapeDtypeStruct((T * B, 2 * Hp), jnp.float32),
        # Gridless: single invocation, full arrays resident in VMEM, one
        # lane-dense HBM writeback at the end.
    )(xw, wh_t, wc_pad, h0, c0)

    out = packed.reshape(T, B, 2 * Hp)
    hiddens = out[:, :, :H]
    memorys = out[:, :, Hp:Hp + H]
    return hiddens, memorys


def _reference_forward(x, init_hidden, init_memory, params):
    """Pure-JAX reference mirroring the PyTorch loop (for sanity checking)."""
    B, T, I = x.shape
    H = init_hidden.shape[1]
    wx, bx = params["fc_x_w"], params["fc_x_b"]
    wh, bh = params["fc_h_w"], params["fc_h_b"]
    h = init_hidden
    c = jnp.broadcast_to(init_memory, (B, H))
    hs, cs = [], []
    for t in range(T):
        x_t = x[:, t, :]
        y = x_t @ wx.T + bx + h @ wh.T + bh
        i_pre, f_pre, o_pre, g_pre = jnp.split(y, 4, axis=1)
        i = jax.nn.sigmoid(i_pre + params["W_ci"] * c)
        f = jax.nn.sigmoid(f_pre + params["W_cf"] * c)
        g = jnp.tanh(g_pre)
        c = f * c + i * g
        o = jax.nn.sigmoid(o_pre + params["W_co"] * c)
        h = o * jnp.tanh(c)
        hs.append(h)
        cs.append(c)
    return jnp.stack(hs, 0), jnp.stack(cs, 0)


if __name__ == "__main__":
    # Shapes implied by the module: input_size = c*n (c=4, n=16 -> 64),
    # batch=2, seq=8, hidden=32.
    B, T, C, N, H = 2, 8, 4, 16, 32
    I = C * N

    key = jax.random.PRNGKey(0)
    ks = jax.random.split(key, 10)

    # Deterministic synthetic parameter init (PyTorch-Linear-like uniform).
    bound_x = 1.0 / (I ** 0.5)
    bound_h = 1.0 / (H ** 0.5)
    params = {
        "fc_x_w": jax.random.uniform(ks[0], (4 * H, I), jnp.float32, -bound_x, bound_x),
        "fc_x_b": jax.random.uniform(ks[1], (4 * H,), jnp.float32, -bound_x, bound_x),
        "fc_h_w": jax.random.uniform(ks[2], (4 * H, H), jnp.float32, -bound_h, bound_h),
        "fc_h_b": jax.random.uniform(ks[3], (4 * H,), jnp.float32, -bound_h, bound_h),
        "W_ci": jax.random.normal(ks[4], (H,), jnp.float32) * 0.1,
        "W_cf": jax.random.normal(ks[5], (H,), jnp.float32) * 0.1,
        "W_co": jax.random.normal(ks[6], (H,), jnp.float32) * 0.1,
    }

    x = jax.random.normal(ks[7], (B, T, I), jnp.float32)
    init_hidden = jax.random.normal(ks[8], (B, H), jnp.float32)
    init_memory = jax.random.normal(ks[9], (H,), jnp.float32)

    hiddens, memorys = fc_lstm_forward(x, init_hidden, init_memory, params)
    hiddens = jax.block_until_ready(hiddens)
    memorys = jax.block_until_ready(memorys)

    ref_h, ref_c = _reference_forward(x, init_hidden, init_memory, params)
    assert hiddens.shape == (T, B, H) and memorys.shape == (T, B, H)
    assert jnp.allclose(hiddens, ref_h, atol=1e-5, rtol=1e-5)
    assert jnp.allclose(memorys, ref_c, atol=1e-5, rtol=1e-5)

    print("KERNEL_OK")
</pallas_src>

<mosaic_0001>
module attributes {stable_mosaic.version = 11 : i64} {
  func.func @_fc_lstm_kernel(%arg0: memref<8x2x512xf32, #tpu.memory_space<vmem>>, %arg1: memref<128x512xf32, #tpu.memory_space<vmem>>, %arg2: memref<3x128xf32, #tpu.memory_space<vmem>>, %arg3: memref<2x128xf32, #tpu.memory_space<vmem>>, %arg4: memref<2x128xf32, #tpu.memory_space<vmem>>, %arg5: memref<16x256xf32, #tpu.memory_space<vmem>>) attributes {dimension_semantics = [], scalar_prefetch = 0 : i64, scratch_operands = 0 : i64, tpu.core_type = #tpu.core_type<tc>} {
    %c0 = arith.constant 0 : index
    %c0_0 = arith.constant 0 : index
    %0 = vector.load %arg1[%c0, %c0_0] : memref<128x512xf32, #tpu.memory_space<vmem>>, vector<128x512xf32>
    %c0_1 = arith.constant 0 : index
    %c0_2 = arith.constant 0 : index
    %1 = vector.load %arg2[%c0_1, %c0_2] : memref<3x128xf32, #tpu.memory_space<vmem>>, vector<3x128xf32>
    %2 = vector.extract_strided_slice %1 {offsets = [0, 0], sizes = [1, 128], strides = [1, 1]} : vector<3x128xf32> to vector<1x128xf32>
    %3 = vector.extract_strided_slice %1 {offsets = [1, 0], sizes = [1, 128], strides = [1, 1]} : vector<3x128xf32> to vector<1x128xf32>
    %4 = vector.extract_strided_slice %1 {offsets = [2, 0], sizes = [1, 128], strides = [1, 1]} : vector<3x128xf32> to vector<1x128xf32>
    %c0_3 = arith.constant 0 : index
    %c0_4 = arith.constant 0 : index
    %5 = vector.load %arg3[%c0_3, %c0_4] : memref<2x128xf32, #tpu.memory_space<vmem>>, vector<2x128xf32>
    %c0_5 = arith.constant 0 : index
    %c0_6 = arith.constant 0 : index
    %6 = vector.load %arg4[%c0_5, %c0_6] : memref<2x128xf32, #tpu.memory_space<vmem>>, vector<2x128xf32>
    %c0_7 = arith.constant 0 : index
    %c0_8 = arith.constant 0 : index
    %c0_9 = arith.constant 0 : index
    %7 = vector.load %arg0[%c0_7, %c0_8, %c0_9] : memref<8x2x512xf32, #tpu.memory_space<vmem>>, vector<1x2x512xf32>
    %8 = vector.shape_cast %7 : vector<1x2x512xf32> to vector<2x512xf32>
    %cst = arith.constant dense<0.000000e+00> : vector<2x512xf32>
    %9 = tpu.matmul %5, %0, %cst {dimension_numbers = #tpu.dot_dimension_numbers<[1], [0], [0], [1], [0, 0, 1, 1], [], []>} : vector<2x128xf32>, vector<128x512xf32>, vector<2x512xf32> -> vector<2x512xf32>
    %10 = arith.addf %8, %9 : vector<2x512xf32>
    %11 = vector.extract_strided_slice %10 {offsets = [0, 0], sizes = [2, 128], strides = [1, 1]} : vector<2x512xf32> to vector<2x128xf32>
    %12 = vector.broadcast %2 : vector<1x128xf32> to vector<2x128xf32>
    %13 = arith.mulf %12, %6 : vector<2x128xf32>
    %14 = arith.addf %11, %13 : vector<2x128xf32>
    %15 = arith.negf %14 : vector<2x128xf32>
    %16 = math.exp %15 : vector<2x128xf32>
    %cst_10 = arith.constant 1.000000e+00 : f32
    %17 = vector.broadcast %cst_10 : f32 to vector<2x128xf32>
    %18 = arith.addf %17, %16 : vector<2x128xf32>
    %19 = arith.divf %17, %18 : vector<2x128xf32>
    %20 = vector.extract_strided_slice %10 {offsets = [0, 128], sizes = [2, 128], strides = [1, 1]} : vector<2x512xf32> to vector<2x128xf32>
    %21 = vector.broadcast %3 : vector<1x128xf32> to vector<2x128xf32>
    %22 = arith.mulf %21, %6 : vector<2x128xf32>
    %23 = arith.addf %20, %22 : vector<2x128xf32>
    %24 = arith.negf %23 : vector<2x128xf32>
    %25 = math.exp %24 : vector<2x128xf32>
    %cst_11 = arith.constant 1.000000e+00 : f32
    %26 = vector.broadcast %cst_11 : f32 to vector<2x128xf32>
    %27 = arith.addf %26, %25 : vector<2x128xf32>
    %28 = arith.divf %26, %27 : vector<2x128xf32>
    %29 = vector.extract_strided_slice %10 {offsets = [0, 256], sizes = [2, 128], strides = [1, 1]} : vector<2x512xf32> to vector<2x128xf32>
    %30 = vector.extract_strided_slice %10 {offsets = [0, 384], sizes = [2, 128], strides = [1, 1]} : vector<2x512xf32> to vector<2x128xf32>
    %31 = math.tanh %30 : vector<2x128xf32>
    %32 = arith.mulf %28, %6 : vector<2x128xf32>
    %33 = arith.mulf %19, %31 : vector<2x128xf32>
    %34 = arith.addf %32, %33 : vector<2x128xf32>
    %35 = vector.broadcast %4 : vector<1x128xf32> to vector<2x128xf32>
    %36 = arith.mulf %35, %34 : vector<2x128xf32>
    %37 = arith.addf %29, %36 : vector<2x128xf32>
    %38 = arith.negf %37 : vector<2x128xf32>
    %39 = math.exp %38 : vector<2x128xf32>
    %cst_12 = arith.constant 1.000000e+00 : f32
    %40 = vector.broadcast %cst_12 : f32 to vector<2x128xf32>
    %41 = arith.addf %40, %39 : vector<2x128xf32>
    %42 = arith.divf %40, %41 : vector<2x128xf32>
    %43 = math.tanh %34 : vector<2x128xf32>
    %44 = arith.mulf %42, %43 : vector<2x128xf32>
    %c0_13 = arith.constant 0 : index
    %c0_14 = arith.constant 0 : index
    %45 = vector.load %arg5[%c0_13, %c0_14] : memref<16x256xf32, #tpu.memory_space<vmem>>, vector<2x128xf32>
    tpu.vector_store %arg5[%c0_13, %c0_14], %44 {strides = array<i32>} : memref<16x256xf32, #tpu.memory_space<vmem>>, vector<2x128xf32>,
    %c0_15 = arith.constant 0 : index
    %c128 = arith.constant 128 : index
    %46 = vector.load %arg5[%c0_15, %c128] : memref<16x256xf32, #tpu.memory_space<vmem>>, vector<2x128xf32>
    tpu.vector_store %arg5[%c0_15, %c128], %34 {strides = array<i32>} : memref<16x256xf32, #tpu.memory_space<vmem>>, vector<2x128xf32>,
    %c1 = arith.constant 1 : index
    %c0_16 = arith.constant 0 : index
    %c0_17 = arith.constant 0 : index
    %47 = vector.load %arg0[%c1, %c0_16, %c0_17] : memref<8x2x512xf32, #tpu.memory_space<vmem>>, vector<1x2x512xf32>
    %48 = vector.shape_cast %47 : vector<1x2x512xf32> to vector<2x512xf32>
    %cst_18 = arith.constant dense<0.000000e+00> : vector<2x512xf32>
    %49 = tpu.matmul %44, %0, %cst_18 {dimension_numbers = #tpu.dot_dimension_numbers<[1], [0], [0], [1], [0, 0, 1, 1], [], []>} : vector<2x128xf32>, vector<128x512xf32>, vector<2x512xf32> -> vector<2x512xf32>
    %50 = arith.addf %48, %49 : vector<2x512xf32>
    %51 = vector.extract_strided_slice %50 {offsets = [0, 0], sizes = [2, 128], strides = [1, 1]} : vector<2x512xf32> to vector<2x128xf32>
    %52 = vector.broadcast %2 : vector<1x128xf32> to vector<2x128xf32>
    %53 = arith.mulf %52, %34 : vector<2x128xf32>
    %54 = arith.addf %51, %53 : vector<2x128xf32>
    %55 = arith.negf %54 : vector<2x128xf32>
    %56 = math.exp %55 : vector<2x128xf32>
    %cst_19 = arith.constant 1.000000e+00 : f32
    %57 = vector.broadcast %cst_19 : f32 to vector<2x128xf32>
    %58 = arith.addf %57, %56 : vector<2x128xf32>
    %59 = arith.divf %57, %58 : vector<2x128xf32>
    %60 = vector.extract_strided_slice %50 {offsets = [0, 128], sizes = [2, 128], strides = [1, 1]} : vector<2x512xf32> to vector<2x128xf32>
    %61 = vector.broadcast %3 : vector<1x128xf32> to vector<2x128xf32>
    %62 = arith.mulf %61, %34 : vector<2x128xf32>
    %63 = arith.addf %60, %62 : vector<2x128xf32>
    %64 = arith.negf %63 : vector<2x128xf32>
    %65 = math.exp %64 : vector<2x128xf32>
    %cst_20 = arith.constant 1.000000e+00 : f32
    %66 = vector.broadcast %cst_20 : f32 to vector<2x128xf32>
    %67 = arith.addf %66, %65 : vector<2x128xf32>
    %68 = arith.divf %66, %67 : vector<2x128xf32>
    %69 = vector.extract_strided_slice %50 {offsets = [0, 256], sizes = [2, 128], strides = [1, 1]} : vector<2x512xf32> to vector<2x128xf32>
    %70 = vector.extract_strided_slice %50 {offsets = [0, 384], sizes = [2, 128], strides = [1, 1]} : vector<2x512xf32> to vector<2x128xf32>
    %71 = math.tanh %70 : vector<2x128xf32>
    %72 = arith.mulf %68, %34 : vector<2x128xf32>
    %73 = arith.mulf %59, %71 : vector<2x128xf32>
    %74 = arith.addf %72, %73 : vector<2x128xf32>
    %75 = vector.broadcast %4 : vector<1x128xf32> to vector<2x128xf32>
    %76 = arith.mulf %75, %74 : vector<2x128xf32>
    %77 = arith.addf %69, %76 : vector<2x128xf32>
    %78 = arith.negf %77 : vector<2x128xf32>
    %79 = math.exp %78 : vector<2x128xf32>
    %cst_21 = arith.constant 1.000000e+00 : f32
    %80 = vector.broadcast %cst_21 : f32 to vector<2x128xf32>
    %81 = arith.addf %80, %79 : vector<2x128xf32>
    %82 = arith.divf %80, %81 : vector<2x128xf32>
    %83 = math.tanh %74 : vector<2x128xf32>
    %84 = arith.mulf %82, %83 : vector<2x128xf32>
    %c2 = arith.constant 2 : index
    %c0_22 = arith.constant 0 : index
    %85 = vector.load %arg5[%c2, %c0_22] : memref<16x256xf32, #tpu.memory_space<vmem>>, vector<2x128xf32>
    tpu.vector_store %arg5[%c2, %c0_22], %84 {strides = array<i32>} : memref<16x256xf32, #tpu.memory_space<vmem>>, vector<2x128xf32>,
    %c2_23 = arith.constant 2 : index
    %c128_24 = arith.constant 128 : index
    %86 = vector.load %arg5[%c2_23, %c128_24] : memref<16x256xf32, #tpu.memory_space<vmem>>, vector<2x128xf32>
    tpu.vector_store %arg5[%c2_23, %c128_24], %74 {strides = array<i32>} : memref<16x256xf32, #tpu.memory_space<vmem>>, vector<2x128xf32>,
    %c2_25 = arith.constant 2 : index
    %c0_26 = arith.constant 0 : index
    %c0_27 = arith.constant 0 : index
    %87 = vector.load %arg0[%c2_25, %c0_26, %c0_27] : memref<8x2x512xf32, #tpu.memory_space<vmem>>, vector<1x2x512xf32>
    %88 = vector.shape_cast %87 : vector<1x2x512xf32> to vector<2x512xf32>
    %cst_28 = arith.constant dense<0.000000e+00> : vector<2x512xf32>
    %89 = tpu.matmul %84, %0, %cst_28 {dimension_numbers = #tpu.dot_dimension_numbers<[1], [0], [0], [1], [0, 0, 1, 1], [], []>} : vector<2x128xf32>, vector<128x512xf32>, vector<2x512xf32> -> vector<2x512xf32>
    %90 = arith.addf %88, %89 : vector<2x512xf32>
    %91 = vector.extract_strided_slice %90 {offsets = [0, 0], sizes = [2, 128], strides = [1, 1]} : vector<2x512xf32> to vector<2x128xf32>
    %92 = vector.broadcast %2 : vector<1x128xf32> to vector<2x128xf32>
    %93 = arith.mulf %92, %74 : vector<2x128xf32>
    %94 = arith.addf %91, %93 : vector<2x128xf32>
    %95 = arith.negf %94 : vector<2x128xf32>
    %96 = math.exp %95 : vector<2x128xf32>
    %cst_29 = arith.constant 1.000000e+00 : f32
    %97 = vector.broadcast %cst_29 : f32 to vector<2x128xf32>
    %98 = arith.addf %97, %96 : vector<2x128xf32>
    %99 = arith.divf %97, %98 : vector<2x128xf32>
    %100 = vector.extract_strided_slice %90 {offsets = [0, 128], sizes = [2, 128], strides = [1, 1]} : vector<2x512xf32> to vector<2x128xf32>
    %101 = vector.broadcast %3 : vector<1x128xf32> to vector<2x128xf32>
    %102 = arith.mulf %101, %74 : vector<2x128xf32>
    %103 = arith.addf %100, %102 : vector<2x128xf32>
    %104 = arith.negf %103 : vector<2x128xf32>
    %105 = math.exp %104 : vector<2x128xf32>
    %cst_30 = arith.constant 1.000000e+00 : f32
    %106 = vector.broadcast %cst_30 : f32 to vector<2x128xf32>
    %107 = arith.addf %106, %105 : vector<2x128xf32>
    %108 = arith.divf %106, %107 : vector<2x128xf32>
    %109 = vector.extract_strided_slice %90 {offsets = [0, 256], sizes = [2, 128], strides = [1, 1]} : vector<2x512xf32> to vector<2x128xf32>
    %110 = vector.extract_strided_slice %90 {offsets = [0, 384], sizes = [2, 128], strides = [1, 1]} : vector<2x512xf32> to vector<2x128xf32>
    %111 = math.tanh %110 : vector<2x128xf32>
    %112 = arith.mulf %108, %74 : vector<2x128xf32>
    %113 = arith.mulf %99, %111 : vector<2x128xf32>
    %114 = arith.addf %112, %113 : vector<2x128xf32>
    %115 = vector.broadcast %4 : vector<1x128xf32> to vector<2x128xf32>
    %116 = arith.mulf %115, %114 : vector<2x128xf32>
    %117 = arith.addf %109, %116 : vector<2x128xf32>
    %118 = arith.negf %117 : vector<2x128xf32>
    %119 = math.exp %118 : vector<2x128xf32>
    %cst_31 = arith.constant 1.000000e+00 : f32
    %120 = vector.broadcast %cst_31 : f32 to vector<2x128xf32>
    %121 = arith.addf %120, %119 : vector<2x128xf32>
    %122 = arith.divf %120, %121 : vector<2x128xf32>
    %123 = math.tanh %114 : vector<2x128xf32>
    %124 = arith.mulf %122, %123 : vector<2x128xf32>
    %c4 = arith.constant 4 : index
    %c0_32 = arith.constant 0 : index
    %125 = vector.load %arg5[%c4, %c0_32] : memref<16x256xf32, #tpu.memory_space<vmem>>, vector<2x128xf32>
    tpu.vector_store %arg5[%c4, %c0_32], %124 {strides = array<i32>} : memref<16x256xf32, #tpu.memory_space<vmem>>, vector<2x128xf32>,
    %c4_33 = arith.constant 4 : index
    %c128_34 = arith.constant 128 : index
    %126 = vector.load %arg5[%c4_33, %c128_34] : memref<16x256xf32, #tpu.memory_space<vmem>>, vector<2x128xf32>
    tpu.vector_store %arg5[%c4_33, %c128_34], %114 {strides = array<i32>} : memref<16x256xf32, #tpu.memory_space<vmem>>, vector<2x128xf32>,
    %c3 = arith.constant 3 : index
    %c0_35 = arith.constant 0 : index
    %c0_36 = arith.constant 0 : index
    %127 = vector.load %arg0[%c3, %c0_35, %c0_36] : memref<8x2x512xf32, #tpu.memory_space<vmem>>, vector<1x2x512xf32>
    %128 = vector.shape_cast %127 : vector<1x2x512xf32> to vector<2x512xf32>
    %cst_37 = arith.constant dense<0.000000e+00> : vector<2x512xf32>
    %129 = tpu.matmul %124, %0, %cst_37 {dimension_numbers = #tpu.dot_dimension_numbers<[1], [0], [0], [1], [0, 0, 1, 1], [], []>} : vector<2x128xf32>, vector<128x512xf32>, vector<2x512xf32> -> vector<2x512xf32>
    %130 = arith.addf %128, %129 : vector<2x512xf32>
    %131 = vector.extract_strided_slice %130 {offsets = [0, 0], sizes = [2, 128], strides = [1, 1]} : vector<2x512xf32> to vector<2x128xf32>
    %132 = vector.broadcast %2 : vector<1x128xf32> to vector<2x128xf32>
    %133 = arith.mulf %132, %114 : vector<2x128xf32>
    %134 = arith.addf %131, %133 : vector<2x128xf32>
    %135 = arith.negf %134 : vector<2x128xf32>
    %136 = math.exp %135 : vector<2x128xf32>
    %cst_38 = arith.constant 1.000000e+00 : f32
    %137 = vector.broadcast %cst_38 : f32 to vector<2x128xf32>
    %138 = arith.addf %137, %136 : vector<2x128xf32>
    %139 = arith.divf %137, %138 : vector<2x128xf32>
    %140 = vector.extract_strided_slice %130 {offsets = [0, 128], sizes = [2, 128], strides = [1, 1]} : vector<2x512xf32> to vector<2x128xf32>
    %141 = vector.broadcast %3 : vector<1x128xf32> to vector<2x128xf32>
    %142 = arith.mulf %141, %114 : vector<2x128xf32>
    %143 = arith.addf %140, %142 : vector<2x128xf32>
    %144 = arith.negf %143 : vector<2x128xf32>
    %145 = math.exp %144 : vector<2x128xf32>
    %cst_39 = arith.constant 1.000000e+00 : f32
    %146 = vector.broadcast %cst_39 : f32 to vector<2x128xf32>
    %147 = arith.addf %146, %145 : vector<2x128xf32>
    %148 = arith.divf %146, %147 : vector<2x128xf32>
    %149 = vector.extract_strided_slice %130 {offsets = [0, 256], sizes = [2, 128], strides = [1, 1]} : vector<2x512xf32> to vector<2x128xf32>
    %150 = vector.extract_strided_slice %130 {offsets = [0, 384], sizes = [2, 128], strides = [1, 1]} : vector<2x512xf32> to vector<2x128xf32>
    %151 = math.tanh %150 : vector<2x128xf32>
    %152 = arith.mulf %148, %114 : vector<2x128xf32>
    %153 = arith.mulf %139, %151 : vector<2x128xf32>
    %154 = arith.addf %152, %153 : vector<2x128xf32>
    %155 = vector.broadcast %4 : vector<1x128xf32> to vector<2x128xf32>
    %156 = arith.mulf %155, %154 : vector<2x128xf32>
    %157 = arith.addf %149, %156 : vector<2x128xf32>
    %158 = arith.negf %157 : vector<2x128xf32>
    %159 = math.exp %158 : vector<2x128xf32>
    %cst_40 = arith.constant 1.000000e+00 : f32
    %160 = vector.broadcast %cst_40 : f32 to vector<2x128xf32>
    %161 = arith.addf %160, %159 : vector<2x128xf32>
    %162 = arith.divf %160, %161 : vector<2x128xf32>
    %163 = math.tanh %154 : vector<2x128xf32>
    %164 = arith.mulf %162, %163 : vector<2x128xf32>
    %c6 = arith.constant 6 : index
    %c0_41 = arith.constant 0 : index
    %165 = vector.load %arg5[%c6, %c0_41] : memref<16x256xf32, #tpu.memory_space<vmem>>, vector<2x128xf32>
    tpu.vector_store %arg5[%c6, %c0_41], %164 {strides = array<i32>} : memref<16x256xf32, #tpu.memory_space<vmem>>, vector<2x128xf32>,
    %c6_42 = arith.constant 6 : index
    %c128_43 = arith.constant 128 : index
    %166 = vector.load %arg5[%c6_42, %c128_43] : memref<16x256xf32, #tpu.memory_space<vmem>>, vector<2x128xf32>
    tpu.vector_store %arg5[%c6_42, %c128_43], %154 {strides = array<i32>} : memref<16x256xf32, #tpu.memory_space<vmem>>, vector<2x128xf32>,
    %c4_44 = arith.constant 4 : index
    %c0_45 = arith.constant 0 : index
    %c0_46 = arith.constant 0 : index
    %167 = vector.load %arg0[%c4_44, %c0_45, %c0_46] : memref<8x2x512xf32, #tpu.memory_space<vmem>>, vector<1x2x512xf32>
    %168 = vector.shape_cast %167 : vector<1x2x512xf32> to vector<2x512xf32>
    %cst_47 = arith.constant dense<0.000000e+00> : vector<2x512xf32>
    %169 = tpu.matmul %164, %0, %cst_47 {dimension_numbers = #tpu.dot_dimension_numbers<[1], [0], [0], [1], [0, 0, 1, 1], [], []>} : vector<2x128xf32>, vector<128x512xf32>, vector<2x512xf32> -> vector<2x512xf32>
    %170 = arith.addf %168, %169 : vector<2x512xf32>
    %171 = vector.extract_strided_slice %170 {offsets = [0, 0], sizes = [2, 128], strides = [1, 1]} : vector<2x512xf32> to vector<2x128xf32>
    %172 = vector.broadcast %2 : vector<1x128xf32> to vector<2x128xf32>
    %173 = arith.mulf %172, %154 : vector<2x128xf32>
    %174 = arith.addf %171, %173 : vector<2x128xf32>
    %175 = arith.negf %174 : vector<2x128xf32>
    %176 = math.exp %175 : vector<2x128xf32>
    %cst_48 = arith.constant 1.000000e+00 : f32
    %177 = vector.broadcast %cst_48 : f32 to vector<2x128xf32>
    %178 = arith.addf %177, %176 : vector<2x128xf32>
    %179 = arith.divf %177, %178 : vector<2x128xf32>
    %180 = vector.extract_strided_slice %170 {offsets = [0, 128], sizes = [2, 128], strides = [1, 1]} : vector<2x512xf32> to vector<2x128xf32>
    %181 = vector.broadcast %3 : vector<1x128xf32> to vector<2x128xf32>
    %182 = arith.mulf %181, %154 : vector<2x128xf32>
    %183 = arith.addf %180, %182 : vector<2x128xf32>
    %184 = arith.negf %183 : vector<2x128xf32>
    %185 = math.exp %184 : vector<2x128xf32>
    %cst_49 = arith.constant 1.000000e+00 : f32
    %186 = vector.broadcast %cst_49 : f32 to vector<2x128xf32>
    %187 = arith.addf %186, %185 : vector<2x128xf32>
    %188 = arith.divf %186, %187 : vector<2x128xf32>
    %189 = vector.extract_strided_slice %170 {offsets = [0, 256], sizes = [2, 128], strides = [1, 1]} : vector<2x512xf32> to vector<2x128xf32>
    %190 = vector.extract_strided_slice %170 {offsets = [0, 384], sizes = [2, 128], strides = [1, 1]} : vector<2x512xf32> to vector<2x128xf32>
    %191 = math.tanh %190 : vector<2x128xf32>
    %192 = arith.mulf %188, %154 : vector<2x128xf32>
    %193 = arith.mulf %179, %191 : vector<2x128xf32>
    %194 = arith.addf %192, %193 : vector<2x128xf32>
    %195 = vector.broadcast %4 : vector<1x128xf32> to vector<2x128xf32>
    %196 = arith.mulf %195, %194 : vector<2x128xf32>
    %197 = arith.addf %189, %196 : vector<2x128xf32>
    %198 = arith.negf %197 : vector<2x128xf32>
    %199 = math.exp %198 : vector<2x128xf32>
    %cst_50 = arith.constant 1.000000e+00 : f32
    %200 = vector.broadcast %cst_50 : f32 to vector<2x128xf32>
    %201 = arith.addf %200, %199 : vector<2x128xf32>
    %202 = arith.divf %200, %201 : vector<2x128xf32>
    %203 = math.tanh %194 : vector<2x128xf32>
    %204 = arith.mulf %202, %203 : vector<2x128xf32>
    %c8 = arith.constant 8 : index
    %c0_51 = arith.constant 0 : index
    %205 = vector.load %arg5[%c8, %c0_51] : memref<16x256xf32, #tpu.memory_space<vmem>>, vector<2x128xf32>
    tpu.vector_store %arg5[%c8, %c0_51], %204 {strides = array<i32>} : memref<16x256xf32, #tpu.memory_space<vmem>>, vector<2x128xf32>,
    %c8_52 = arith.constant 8 : index
    %c128_53 = arith.constant 128 : index
    %206 = vector.load %arg5[%c8_52, %c128_53] : memref<16x256xf32, #tpu.memory_space<vmem>>, vector<2x128xf32>
    tpu.vector_store %arg5[%c8_52, %c128_53], %194 {strides = array<i32>} : memref<16x256xf32, #tpu.memory_space<vmem>>, vector<2x128xf32>,
    %c5 = arith.constant 5 : index
    %c0_54 = arith.constant 0 : index
    %c0_55 = arith.constant 0 : index
    %207 = vector.load %arg0[%c5, %c0_54, %c0_55] : memref<8x2x512xf32, #tpu.memory_space<vmem>>, vector<1x2x512xf32>
    %208 = vector.shape_cast %207 : vector<1x2x512xf32> to vector<2x512xf32>
    %cst_56 = arith.constant dense<0.000000e+00> : vector<2x512xf32>
    %209 = tpu.matmul %204, %0, %cst_56 {dimension_numbers = #tpu.dot_dimension_numbers<[1], [0], [0], [1], [0, 0, 1, 1], [], []>} : vector<2x128xf32>, vector<128x512xf32>, vector<2x512xf32> -> vector<2x512xf32>
    %210 = arith.addf %208, %209 : vector<2x512xf32>
    %211 = vector.extract_strided_slice %210 {offsets = [0, 0], sizes = [2, 128], strides = [1, 1]} : vector<2x512xf32> to vector<2x128xf32>
    %212 = vector.broadcast %2 : vector<1x128xf32> to vector<2x128xf32>
    %213 = arith.mulf %212, %194 : vector<2x128xf32>
    %214 = arith.addf %211, %213 : vector<2x128xf32>
    %215 = arith.negf %214 : vector<2x128xf32>
    %216 = math.exp %215 : vector<2x128xf32>
    %cst_57 = arith.constant 1.000000e+00 : f32
    %217 = vector.broadcast %cst_57 : f32 to vector<2x128xf32>
    %218 = arith.addf %217, %216 : vector<2x128xf32>
    %219 = arith.divf %217, %218 : vector<2x128xf32>
    %220 = vector.extract_strided_slice %210 {offsets = [0, 128], sizes = [2, 128], strides = [1, 1]} : vector<2x512xf32> to vector<2x128xf32>
    %221 = vector.broadcast %3 : vector<1x128xf32> to vector<2x128xf32>
    %222 = arith.mulf %221, %194 : vector<2x128xf32>
    %223 = arith.addf %220, %222 : vector<2x128xf32>
    %224 = arith.negf %223 : vector<2x128xf32>
    %225 = math.exp %224 : vector<2x128xf32>
    %cst_58 = arith.constant 1.000000e+00 : f32
    %226 = vector.broadcast %cst_58 : f32 to vector<2x128xf32>
    %227 = arith.addf %226, %225 : vector<2x128xf32>
    %228 = arith.divf %226, %227 : vector<2x128xf32>
    %229 = vector.extract_strided_slice %210 {offsets = [0, 256], sizes = [2, 128], strides = [1, 1]} : vector<2x512xf32> to vector<2x128xf32>
    %230 = vector.extract_strided_slice %210 {offsets = [0, 384], sizes = [2, 128], strides = [1, 1]} : vector<2x512xf32> to vector<2x128xf32>
    %231 = math.tanh %230 : vector<2x128xf32>
    %232 = arith.mulf %228, %194 : vector<2x128xf32>
    %233 = arith.mulf %219, %231 : vector<2x128xf32>
    %234 = arith.addf %232, %233 : vector<2x128xf32>
    %235 = vector.broadcast %4 : vector<1x128xf32> to vector<2x128xf32>
    %236 = arith.mulf %235, %234 : vector<2x128xf32>
    %237 = arith.addf %229, %236 : vector<2x128xf32>
    %238 = arith.negf %237 : vector<2x128xf32>
    %239 = math.exp %238 : vector<2x128xf32>
    %cst_59 = arith.constant 1.000000e+00 : f32
    %240 = vector.broadcast %cst_59 : f32 to vector<2x128xf32>
    %241 = arith.addf %240, %239 : vector<2x128xf32>
    %242 = arith.divf %240, %241 : vector<2x128xf32>
    %243 = math.tanh %234 : vector<2x128xf32>
    %244 = arith.mulf %242, %243 : vector<2x128xf32>
    %c10 = arith.constant 10 : index
    %c0_60 = arith.constant 0 : index
    %245 = vector.load %arg5[%c10, %c0_60] : memref<16x256xf32, #tpu.memory_space<vmem>>, vector<2x128xf32>
    tpu.vector_store %arg5[%c10, %c0_60], %244 {strides = array<i32>} : memref<16x256xf32, #tpu.memory_space<vmem>>, vector<2x128xf32>,
    %c10_61 = arith.constant 10 : index
    %c128_62 = arith.constant 128 : index
    %246 = vector.load %arg5[%c10_61, %c128_62] : memref<16x256xf32, #tpu.memory_space<vmem>>, vector<2x128xf32>
    tpu.vector_store %arg5[%c10_61, %c128_62], %234 {strides = array<i32>} : memref<16x256xf32, #tpu.memory_space<vmem>>, vector<2x128xf32>,
    %c6_63 = arith.constant 6 : index
    %c0_64 = arith.constant 0 : index
    %c0_65 = arith.constant 0 : index
    %247 = vector.load %arg0[%c6_63, %c0_64, %c0_65] : memref<8x2x512xf32, #tpu.memory_space<vmem>>, vector<1x2x512xf32>
    %248 = vector.shape_cast %247 : vector<1x2x512xf32> to vector<2x512xf32>
    %cst_66 = arith.constant dense<0.000000e+00> : vector<2x512xf32>
    %249 = tpu.matmul %244, %0, %cst_66 {dimension_numbers = #tpu.dot_dimension_numbers<[1], [0], [0], [1], [0, 0, 1, 1], [], []>} : vector<2x128xf32>, vector<128x512xf32>, vector<2x512xf32> -> vector<2x512xf32>
    %250 = arith.addf %248, %249 : vector<2x512xf32>
    %251 = vector.extract_strided_slice %250 {offsets = [0, 0], sizes = [2, 128], strides = [1, 1]} : vector<2x512xf32> to vector<2x128xf32>
    %252 = vector.broadcast %2 : vector<1x128xf32> to vector<2x128xf32>
    %253 = arith.mulf %252, %234 : vector<2x128xf32>
    %254 = arith.addf %251, %253 : vector<2x128xf32>
    %255 = arith.negf %254 : vector<2x128xf32>
    %256 = math.exp %255 : vector<2x128xf32>
    %cst_67 = arith.constant 1.000000e+00 : f32
    %257 = vector.broadcast %cst_67 : f32 to vector<2x128xf32>
    %258 = arith.addf %257, %256 : vector<2x128xf32>
    %259 = arith.divf %257, %258 : vector<2x128xf32>
    %260 = vector.extract_strided_slice %250 {offsets = [0, 128], sizes = [2, 128], strides = [1, 1]} : vector<2x512xf32> to vector<2x128xf32>
    %261 = vector.broadcast %3 : vector<1x128xf32> to vector<2x128xf32>
    %262 = arith.mulf %261, %234 : vector<2x128xf32>
    %263 = arith.addf %260, %262 : vector<2x128xf32>
    %264 = arith.negf %263 : vector<2x128xf32>
    %265 = math.exp %264 : vector<2x128xf32>
    %cst_68 = arith.constant 1.000000e+00 : f32
    %266 = vector.broadcast %cst_68 : f32 to vector<2x128xf32>
    %267 = arith.addf %266, %265 : vector<2x128xf32>
    %268 = arith.divf %266, %267 : vector<2x128xf32>
    %269 = vector.extract_strided_slice %250 {offsets = [0, 256], sizes = [2, 128], strides = [1, 1]} : vector<2x512xf32> to vector<2x128xf32>
    %270 = vector.extract_strided_slice %250 {offsets = [0, 384], sizes = [2, 128], strides = [1, 1]} : vector<2x512xf32> to vector<2x128xf32>
    %271 = math.tanh %270 : vector<2x128xf32>
    %272 = arith.mulf %268, %234 : vector<2x128xf32>
    %273 = arith.mulf %259, %271 : vector<2x128xf32>
    %274 = arith.addf %272, %273 : vector<2x128xf32>
    %275 = vector.broadcast %4 : vector<1x128xf32> to vector<2x128xf32>
    %276 = arith.mulf %275, %274 : vector<2x128xf32>
    %277 = arith.addf %269, %276 : vector<2x128xf32>
    %278 = arith.negf %277 : vector<2x128xf32>
    %279 = math.exp %278 : vector<2x128xf32>
    %cst_69 = arith.constant 1.000000e+00 : f32
    %280 = vector.broadcast %cst_69 : f32 to vector<2x128xf32>
    %281 = arith.addf %280, %279 : vector<2x128xf32>
    %282 = arith.divf %280, %281 : vector<2x128xf32>
    %283 = math.tanh %274 : vector<2x128xf32>
    %284 = arith.mulf %282, %283 : vector<2x128xf32>
    %c12 = arith.constant 12 : index
    %c0_70 = arith.constant 0 : index
    %285 = vector.load %arg5[%c12, %c0_70] : memref<16x256xf32, #tpu.memory_space<vmem>>, vector<2x128xf32>
    tpu.vector_store %arg5[%c12, %c0_70], %284 {strides = array<i32>} : memref<16x256xf32, #tpu.memory_space<vmem>>, vector<2x128xf32>,
    %c12_71 = arith.constant 12 : index
    %c128_72 = arith.constant 128 : index
    %286 = vector.load %arg5[%c12_71, %c128_72] : memref<16x256xf32, #tpu.memory_space<vmem>>, vector<2x128xf32>
    tpu.vector_store %arg5[%c12_71, %c128_72], %274 {strides = array<i32>} : memref<16x256xf32, #tpu.memory_space<vmem>>, vector<2x128xf32>,
    %c7 = arith.constant 7 : index
    %c0_73 = arith.constant 0 : index
    %c0_74 = arith.constant 0 : index
    %287 = vector.load %arg0[%c7, %c0_73, %c0_74] : memref<8x2x512xf32, #tpu.memory_space<vmem>>, vector<1x2x512xf32>
    %288 = vector.shape_cast %287 : vector<1x2x512xf32> to vector<2x512xf32>
    %cst_75 = arith.constant dense<0.000000e+00> : vector<2x512xf32>
    %289 = tpu.matmul %284, %0, %cst_75 {dimension_numbers = #tpu.dot_dimension_numbers<[1], [0], [0], [1], [0, 0, 1, 1], [], []>} : vector<2x128xf32>, vector<128x512xf32>, vector<2x512xf32> -> vector<2x512xf32>
    %290 = arith.addf %288, %289 : vector<2x512xf32>
    %291 = vector.extract_strided_slice %290 {offsets = [0, 0], sizes = [2, 128], strides = [1, 1]} : vector<2x512xf32> to vector<2x128xf32>
    %292 = vector.broadcast %2 : vector<1x128xf32> to vector<2x128xf32>
    %293 = arith.mulf %292, %274 : vector<2x128xf32>
    %294 = arith.addf %291, %293 : vector<2x128xf32>
    %295 = arith.negf %294 : vector<2x128xf32>
    %296 = math.exp %295 : vector<2x128xf32>
    %cst_76 = arith.constant 1.000000e+00 : f32
    %297 = vector.broadcast %cst_76 : f32 to vector<2x128xf32>
    %298 = arith.addf %297, %296 : vector<2x128xf32>
    %299 = arith.divf %297, %298 : vector<2x128xf32>
    %300 = vector.extract_strided_slice %290 {offsets = [0, 128], sizes = [2, 128], strides = [1, 1]} : vector<2x512xf32> to vector<2x128xf32>
    %301 = vector.broadcast %3 : vector<1x128xf32> to vector<2x128xf32>
    %302 = arith.mulf %301, %274 : vector<2x128xf32>
    %303 = arith.addf %300, %302 : vector<2x128xf32>
    %304 = arith.negf %303 : vector<2x128xf32>
    %305 = math.exp %304 : vector<2x128xf32>
    %cst_77 = arith.constant 1.000000e+00 : f32
    %306 = vector.broadcast %cst_77 : f32 to vector<2x128xf32>
    %307 = arith.addf %306, %305 : vector<2x128xf32>
    %308 = arith.divf %306, %307 : vector<2x128xf32>
    %309 = vector.extract_strided_slice %290 {offsets = [0, 256], sizes = [2, 128], strides = [1, 1]} : vector<2x512xf32> to vector<2x128xf32>
    %310 = vector.extract_strided_slice %290 {offsets = [0, 384], sizes = [2, 128], strides = [1, 1]} : vector<2x512xf32> to vector<2x128xf32>
    %311 = math.tanh %310 : vector<2x128xf32>
    %312 = arith.mulf %308, %274 : vector<2x128xf32>
    %313 = arith.mulf %299, %311 : vector<2x128xf32>
    %314 = arith.addf %312, %313 : vector<2x128xf32>
    %315 = vector.broadcast %4 : vector<1x128xf32> to vector<2x128xf32>
    %316 = arith.mulf %315, %314 : vector<2x128xf32>
    %317 = arith.addf %309, %316 : vector<2x128xf32>
    %318 = arith.negf %317 : vector<2x128xf32>
    %319 = math.exp %318 : vector<2x128xf32>
    %cst_78 = arith.constant 1.000000e+00 : f32
    %320 = vector.broadcast %cst_78 : f32 to vector<2x128xf32>
    %321 = arith.addf %320, %319 : vector<2x128xf32>
    %322 = arith.divf %320, %321 : vector<2x128xf32>
    %323 = math.tanh %314 : vector<2x128xf32>
    %324 = arith.mulf %322, %323 : vector<2x128xf32>
    %c14 = arith.constant 14 : index
    %c0_79 = arith.constant 0 : index
    %325 = vector.load %arg5[%c14, %c0_79] : memref<16x256xf32, #tpu.memory_space<vmem>>, vector<2x128xf32>
    tpu.vector_store %arg5[%c14, %c0_79], %324 {strides = array<i32>} : memref<16x256xf32, #tpu.memory_space<vmem>>, vector<2x128xf32>,
    %c14_80 = arith.constant 14 : index
    %c128_81 = arith.constant 128 : index
    %326 = vector.load %arg5[%c14_80, %c128_81] : memref<16x256xf32, #tpu.memory_space<vmem>>, vector<2x128xf32>
    tpu.vector_store %arg5[%c14_80, %c128_81], %314 {strides = array<i32>} : memref<16x256xf32, #tpu.memory_space<vmem>>, vector<2x128xf32>,
    return
  }
}

</mosaic_0001>

<bundles_post_ra>
// kernel: tpu_custom_call.1
= control target key start
LH: loop header
LB: loop body
LE: loop exit
PB: predicated region body
PF: predicated region fallthrough
CT: control target
= control target key end

     0   :  { %10 = vsyncpa [#allocation3], 0  ;;  %s3197_s0 = inlined_call_operand.hbm [shape: f32[8,2,512], index: 0, kind: input, shape index: {}]   ;;  %s3198_s1 = inlined_call_operand.hbm [shape: f32[128,512], index: 1, kind: input, shape index: {}]   ;;  %s3199_s2 = inlined_call_operand.vmem [shape: f32[3,128], index: 2, kind: input, shape index: {}]   ;;  %s3200_s3 = inlined_call_operand.vmem [shape: f32[2,128], index: 3, kind: input, shape index: {}]   ;;  %s3201_s4 = inlined_call_operand.vmem [shape: f32[2,128], index: 4, kind: input, shape index: {}]   ;;  %s3202_s5 = inlined_call_operand.hbm [shape: f32[16,256], index: 5, kind: output, shape index: {}]  }
   0x1   :  { %11 = vsyncpa [#allocation6], 0 }
   0x2   :  { %12 = vsyncpa [#allocation4], 0  ;;  %s2668_s18 = smov [#allocation2]   ;;  %s2596_s22 = scalar_lea.hbm %s3197_s0, 1024 }
   0x3   :  { %s18_s19 = sshll.u32 %s2668_s18, 4  ;;  %p2597_p0 = scmp.ne.s32.totalorder %s3197_s0, %s2596_s22  ;;  %s19_s19 = int_to_ptr.vmem [resolvable:$true] %s18_s19 }
   0x4   :  { %p2600_p1 = scmp.lt.u32.totalorder %s2596_s22, %s3197_s0 }
   0x6   :  { %p2602_p2 = pnand %p2600_p1, %p2597_p0 }
   0x8   :  { %2605 = shalt.err (!%p2602_p2)
}
   0x9   :  { %s2606_s27 = scalar_lea.vmem %s19_s19, 1024  ;;  %p2611_p4 = scmp.lt.s32.totalorder %s19_s19, %s19_s19 }
   0xa   :  { %p2607_p3 = scmp.ne.s32.totalorder %s19_s19, %s2606_s27  ;;  %p2612_p5 = scmp.lt.s32.totalorder %s2606_s27, %s2606_s27 }
   0xc   :  { %p2613_p6 = por %p2612_p5, %p2611_p4 }
   0xe   :  { %p2614_p7 = pnand %p2613_p6, %p2607_p3 }
  0x10   :  { %2617 = shalt.err (!%p2614_p7)
}
  0x11   :  { %s2669_s28 = smov 128   ;;  %s2670_s29 = smov 8  }
  0x12   :  { %24 = dma.hbm_to_vmem [thread:$0]  %s3197_s0, 1024, %s19_s19, [#allocation3], %s2669_s28, %s2669_s28, %s2670_s29  }
  0x13   :  { %s2671_s7 = smov [#allocation5]   ;;  %s2618_s11 = scalar_lea.hbm %s3198_s1, 8192 }
  0x14   :  { %s30_s8 = sshll.u32 %s2671_s7, 4  ;;  %p2619_p8 = scmp.ne.s32.totalorder %s3198_s1, %s2618_s11  ;;  %s31_s8 = int_to_ptr.vmem [resolvable:$true] %s30_s8 }
  0x15   :  { %p2622_p9 = scmp.lt.u32.totalorder %s2618_s11, %s3198_s1 }
  0x17   :  { %p2624_p10 = pnand %p2622_p9, %p2619_p8 }
  0x19   :  { %2627 = shalt.err (!%p2624_p10)
}
  0x1a   :  { %s2628_s16 = scalar_lea.vmem %s31_s8, 8192  ;;  %p2633_p12 = scmp.lt.s32.totalorder %s31_s8, %s31_s8 }
  0x1b   :  { %p2629_p11 = scmp.ne.s32.totalorder %s31_s8, %s2628_s16  ;;  %p2634_p13 = scmp.lt.s32.totalorder %s2628_s16, %s2628_s16 }
  0x1d   :  { %p2635_p0 = por %p2634_p13, %p2633_p12 }
  0x1f   :  { %p2636_p1 = pnand %p2635_p0, %p2629_p11 }
  0x21   :  { %2639 = shalt.err (!%p2636_p1)
}
  0x22   :  { %s2672_s0 = smov 512   ;;  %s2673_s17 = smov 32  }
  0x23   :  { %36 = dma.hbm_to_vmem [thread:$0]  %s3198_s1, 8192, %s31_s8, [#allocation6], %s2672_s0, %s2672_s0, %s2673_s17  }
  0x24   :  { %2662 = dma.done.wait [#allocation3], 1024  }
  0x25   :  { %2663 = vsyncadd [#allocation3], 4294966272 }
  0x26   :  { %2664 = dma.done.wait [#allocation6], 8192  }
  0x27   :  { %2665 = vsyncadd [#allocation6], 4294959104  ;;  %v2674_v0 = vmov 0.0   ;;  %v50_v1 = vld [vmem:[#allocation5 + $0x8] sm:$0xff]  ;;  %v52_v3 = vld [vmem:[#allocation5 + $0x18] sm:$0xff] }
  0x28   :  { %181 = vmatprep.mubr.f32.mxu0 %v2674_v0  ;;  %252 = vmatprep.mubr.f32.mxu1 %v2674_v0  ;;  %v54_v2 = vld [vmem:[#allocation5 + $0x28] sm:$0xff]  ;;  %v56_v5 = vld [vmem:[#allocation5 + $0x38] sm:$0xff]  ;;  %v49_v6 = vld [vmem:[#allocation5] sm:$0xff] }
  0x29   :  { %v2735_v4 = vpack.c.bf16 %v54_v2, %v50_v1  ;;  %v53_v7 = vld [vmem:[#allocation5 + $0x20] sm:$0xff]  ;;  %v2737_v8 = vpack.c.bf16 %v56_v5, %v52_v3  ;;  %v51_v10 = vld [vmem:[#allocation5 + $0x10] sm:$0xff]  ;;  %v58_v12 = vld [vmem:[#allocation5 + $0x48] sm:$0xff] }
  0x2a   :  { %v2739_v9 = vpack.c.bf16 %v53_v7, %v49_v6  ;;  %v55_v11 = vld [vmem:[#allocation5 + $0x30] sm:$0xff]  ;;  %v62_v14 = vld [vmem:[#allocation5 + $0x68] sm:$0xff]  ;;  %v60_v15 = vld [vmem:[#allocation5 + $0x58] sm:$0xff] }
  0x2b   :  { %1946 = vmatprep.subr.bf16.mxu0 %v2735_v4  ;;  %v2742_v13 = vpack.c.bf16 %v55_v11, %v51_v10  ;;  %v64_v16 = vld [vmem:[#allocation5 + $0x78] sm:$0xff]  ;;  %1978 = vmatprep.subr.bf16.mxu1 %v2737_v8  ;;  %v2746_v17 = vpack.c.bf16 %v62_v14, %v58_v12  ;;  %v57_v19 = vld [vmem:[#allocation5 + $0x40] sm:$0xff]  ;;  %v59_v21 = vld [vmem:[#allocation5 + $0x50] sm:$0xff] }
  0x2c   :  { %1948 = vmatpush1.bf16.msra.mxu0 %v2739_v9  ;;  %v2748_v18 = vpack.c.bf16 %v64_v16, %v60_v15  ;;  %v61_v20 = vld [vmem:[#allocation5 + $0x60] sm:$0xff]  ;;  %v63_v23 = vld [vmem:[#allocation5 + $0x70] sm:$0xff]  ;;  %v66_v24 = vld [vmem:[#allocation5 + $0x88] sm:$0xff] }
  0x2d   :  { %1980 = vmatpush1.bf16.msra.mxu1 %v2742_v13  ;;  %v2751_v22 = vpack.c.bf16 %v61_v20, %v57_v19  ;;  %v70_v25 = vld [vmem:[#allocation5 + $0xa8] sm:$0xff]  ;;  %1950 = vmatprep.subr.bf16.mxu0 %v2746_v17  ;;  %v2755_v26 = vpack.c.bf16 %v63_v23, %v59_v21  ;;  %v68_v28 = vld [vmem:[#allocation5 + $0x98] sm:$0xff]  ;;  %v65_v30 = vld [vmem:[#allocation5 + $0x80] sm:$0xff] }
  0x2e   :  { %1982 = vmatprep.subr.bf16.mxu1 %v2748_v18  ;;  %v2757_v27 = vpack.c.bf16 %v70_v25, %v66_v24  ;;  %v72_v29 = vld [vmem:[#allocation5 + $0xb8] sm:$0xff]  ;;  %v69_v32 = vld [vmem:[#allocation5 + $0xa0] sm:$0xff]  ;;  %v67_v33 = vld [vmem:[#allocation5 + $0x90] sm:$0xff] }
  0x2f   :  { %v2759_v31 = vpack.c.bf16 %v72_v29, %v68_v28  ;;  %v71_v34 = vld [vmem:[#allocation5 + $0xb0] sm:$0xff]  ;;  %v2762_v35 = vpack.c.bf16 %v69_v32, %v65_v30  ;;  %v74_v36 = vld [vmem:[#allocation5 + $0xc8] sm:$0xff]  ;;  %v76_v38 = vld [vmem:[#allocation5 + $0xd8] sm:$0xff] }
  0x30   :  { %1952 = vmatpush1.bf16.msra.mxu0 %v2751_v22  ;;  %v78_v37 = vld [vmem:[#allocation5 + $0xe8] sm:$0xff]  ;;  %v2766_v39 = vpack.c.bf16 %v71_v34, %v67_v33  ;;  %v80_v41 = vld [vmem:[#allocation5 + $0xf8] sm:$0xff]  ;;  %v73_v42 = vld [vmem:[#allocation5 + $0xc0] sm:$0xff] }
  0x31   :  { %1984 = vmatpush1.bf16.msra.mxu1 %v2755_v26  ;;  %1954 = vmatprep.subr.bf16.mxu0 %v2757_v27  ;;  %v2768_v40 = vpack.c.bf16 %v78_v37, %v74_v36  ;;  %v77_v43 = vld [vmem:[#allocation5 + $0xe0] sm:$0xff]  ;;  %v2771_v44 = vpack.c.bf16 %v80_v41, %v76_v38  ;;  %v75_v45 = vld [vmem:[#allocation5 + $0xd0] sm:$0xff]  ;;  %v82_v47 = vld [vmem:[#allocation5 + $0x108] sm:$0xff] }
  0x32   :  { %1986 = vmatprep.subr.bf16.mxu1 %v2759_v31  ;;  %v79_v46 = vld [vmem:[#allocation5 + $0xf0] sm:$0xff]  ;;  %v86_v48 = vld [vmem:[#allocation5 + $0x128] sm:$0xff]  ;;  %v84_v49 = vld [vmem:[#allocation5 + $0x118] sm:$0xff]  ;;  %v2774_v51 = vpack.c.bf16 %v77_v43, %v73_v42 }
  0x33   :  { %v88_v50 = vld [vmem:[#allocation5 + $0x138] sm:$0xff]  ;;  %v2778_v52 = vpack.c.bf16 %v79_v46, %v75_v45  ;;  %v2780_v53 = vpack.c.bf16 %v86_v48, %v82_v47  ;;  %v81_v54 = vld [vmem:[#allocation5 + $0x100] sm:$0xff]  ;;  %v83_v56 = vld [vmem:[#allocation5 + $0x110] sm:$0xff] }
  0x34   :  { %1956 = vmatpush1.bf16.msra.mxu0 %v2762_v35  ;;  %v85_v55 = vld [vmem:[#allocation5 + $0x120] sm:$0xff]  ;;  %v2783_v57 = vpack.c.bf16 %v88_v50, %v84_v49  ;;  %v87_v58 = vld [vmem:[#allocation5 + $0x130] sm:$0xff]  ;;  %v90_v59 = vld [vmem:[#allocation5 + $0x148] sm:$0xff]  ;;  %v2675_v49 = vmov 1983009808  }
  0x35   :  { %1988 = vmatpush1.bf16.msra.mxu1 %v2766_v39  ;;  %1958 = vmatprep.subr.bf16.mxu0 %v2768_v40  ;;  %v94_v60 = vld [vmem:[#allocation5 + $0x168] sm:$0xff]  ;;  %v92_v61 = vld [vmem:[#allocation5 + $0x158] sm:$0xff]  ;;  %v2786_v63 = vpack.c.bf16 %v85_v55, %v81_v54  ;;  %v2790_v1 = vpack.c.bf16 %v87_v58, %v83_v56  ;;  %v89_v3 = vld [vmem:[#allocation5 + $0x140] sm:$0xff]  ;;  %v266_v50 = vunpack.c.l.s4 %v2675_v49  ;;  %v268_v54 = vlaneseq }
  0x36   :  { %1990 = vmatprep.subr.bf16.mxu1 %v2771_v44  ;;  %v96_v62 = vld [vmem:[#allocation5 + $0x178] sm:$0xff]  ;;  %v2792_v2 = vpack.c.bf16 %v94_v60, %v90_v59  ;;  %v93_v5 = vld [vmem:[#allocation5 + $0x160] sm:$0xff]  ;;  %v91_v6 = vld [vmem:[#allocation5 + $0x150] sm:$0xff] }
  0x37   :  { %v2795_v7 = vpack.c.bf16 %v96_v62, %v92_v61  ;;  %v95_v10 = vld [vmem:[#allocation5 + $0x170] sm:$0xff]  ;;  %v98_v11 = vld [vmem:[#allocation5 + $0x188] sm:$0xff]  ;;  %v100_v14 = vld [vmem:[#allocation5 + $0x198] sm:$0xff]  ;;  %v2798_v16 = vpack.c.bf16 %v93_v5, %v89_v3  ;;  %v267_v55 = vunpack.c.0.s8 %v266_v50  ;;  %v269_v56 = vshrl.u32 %v268_v54, 7 }
  0x38   :  { %1960 = vmatpush1.bf16.msra.mxu0 %v2774_v51  ;;  %v102_v12 = vld [vmem:[#allocation5 + $0x1a8] sm:$0xff]  ;;  %v104_v15 = vld [vmem:[#allocation5 + $0x1b8] sm:$0xff]  ;;  %v2802_v19 = vpack.c.bf16 %v95_v10, %v91_v6  ;;  %v97_v21 = vld [vmem:[#allocation5 + $0x180] sm:$0xff] }
  0x39   :  { %1992 = vmatpush1.bf16.msra.mxu1 %v2778_v52  ;;  %1962 = vmatprep.subr.bf16.mxu0 %v2780_v53  ;;  %v2804_v20 = vpack.c.bf16 %v102_v12, %v98_v11  ;;  %v101_v23 = vld [vmem:[#allocation5 + $0x1a0] sm:$0xff]  ;;  %v99_v24 = vld [vmem:[#allocation5 + $0x190] sm:$0xff]  ;;  %v2807_v25 = vpack.c.bf16 %v104_v15, %v100_v14  ;;  %v106_v29 = vld [vmem:[#allocation5 + $0x1c8] sm:$0xff]  ;;  %v284_v58 = vsub.s32 0, %v269_v56  ;;  %v2870_v60 = vsub.s32 %v267_v55, %v269_v56 }
  0x3a   :  { %1994 = vmatprep.subr.bf16.mxu1 %v2783_v57  ;;  %v103_v28 = vld [vmem:[#allocation5 + $0x1b0] sm:$0xff]  ;;  %v110_v30 = vld [vmem:[#allocation5 + $0x1e8] sm:$0xff]  ;;  %v108_v32 = vld [vmem:[#allocation5 + $0x1d8] sm:$0xff]  ;;  %v2810_v34 = vpack.c.bf16 %v101_v23, %v97_v21  ;;  %v296_v5 = vsub.s32 1, %v269_v56 }
  0x3b   :  { %v112_v33 = vld [vmem:[#allocation5 + $0x1f8] sm:$0xff]  ;;  %v2814_v36 = vpack.c.bf16 %v103_v28, %v99_v24  ;;  %v2816_v37 = vpack.c.bf16 %v110_v30, %v106_v29  ;;  %v105_v38 = vld [vmem:[#allocation5 + $0x1c0] sm:$0xff]  ;;  %v107_v43 = vld [vmem:[#allocation5 + $0x1d0] sm:$0xff] }
  0x3c   :  { %1964 = vmatpush1.bf16.msra.mxu0 %v2786_v63  ;;  %v109_v41 = vld [vmem:[#allocation5 + $0x1e0] sm:$0xff]  ;;  %v2819_v42 = vpack.c.bf16 %v112_v33, %v108_v32  ;;  %v111_v45 = vld [vmem:[#allocation5 + $0x1f0] sm:$0xff] }
  0x3d   :  { %1996 = vmatpush1.bf16.msra.mxu1 %v2790_v1  ;;  %1966 = vmatprep.subr.bf16.mxu0 %v2792_v2  ;;  %v2822_v46 = vpack.c.bf16 %v109_v41, %v105_v38  ;;  %v2826_v47 = vpack.c.bf16 %v111_v45, %v107_v43  ;;  %v114_v48 = vld [vmem:[%s3200_s3] sm:$0x3] }
  0x3e   :  { %1998 = vmatprep.subr.bf16.mxu1 %v2795_v7  ;;  %v113_v61 = vld [vmem:[%s3199_s2] sm:$0x7]  ;;  %s2676_s2 = smov [#allocation7]  }
  0x3f   :  { %v2875_v12 = vrot.slane %v113_v61, %v284_v58  ;;  %v115_v15 = vld [vmem:[%s3201_s4] sm:$0x3]  ;;  %v2882_v23 = vrot.slane %v113_v61, %v296_v5  ;;  %v317_v58 = vsub.s32 2, %v269_v56  ;;  %s1904_s4 = sshll.u32 %s2676_s2, 4  ;;  %s1905_s4 = int_to_ptr.vmem [resolvable:$true] %s1904_s4 }
  0x40   :  { %1968 = vmatpush1.bf16.msra.mxu0 %v2798_v16  ;;  %v116_v24 = vld [vmem:[#allocation2] sm:$0xff]  ;;  %s2640_s24 = scalar_lea.vmem %s1905_s4, 512  ;;  %p2645_p3 = scmp.lt.s32.totalorder %s1905_s4, %s1905_s4 }
  0x41   :  { %2000 = vmatpush1.bf16.msra.mxu1 %v2802_v19  ;;  %1970 = vmatprep.subr.bf16.mxu0 %v2804_v20  ;;  %v286_v29 = vmul.f32 %v2875_v12, %v115_v15  ;;  %v298_v32 = vmul.f32 %v2882_v23, %v115_v15  ;;  %p2641_p2 = scmp.ne.s32.totalorder %s1905_s4, %s2640_s24  ;;  %p2646_p4 = scmp.lt.s32.totalorder %s2640_s24, %s2640_s24 }
  0x42   :  { %2002 = vmatprep.subr.bf16.mxu1 %v2807_v25 }
  0x43   :  { %p2647_p5 = por %p2646_p4, %p2645_p3 }
  0x44   :  { %1972 = vmatpush1.bf16.msra.mxu0 %v2810_v34 }
  0x45   :  { %2004 = vmatpush1.bf16.msra.mxu1 %v2814_v36  ;;  %1974 = vmatprep.subr.bf16.mxu0 %v2816_v37  ;;  %p2648_p6 = pnand %p2647_p5, %p2641_p2 }
  0x46   :  { %2006 = vmatprep.subr.bf16.mxu1 %v2819_v42 }
  0x48   :  { %1976 = vmatpush1.bf16.msra.mxu0 %v2822_v46 }
  0x49   :  { %2008 = vmatpush1.bf16.msra.mxu1 %v2826_v47  ;;  %2010 = vmatprep.subr.bf16.mxu0 %v2735_v4 }
  0x4a   :  { %2042 = vmatprep.subr.bf16.mxu1 %v2737_v8 }
  0x4b   :  { %182 = vmatmul.mubr.f32.vlgmr.msra.gmra.mrb[0].mxu0 %v114_v48 }
  0x4c   :  { %253 = vmatmul.mubr.f32.vlgmr.msra.gmra.mrb[0].mxu1 %v114_v48  ;;  %2012 = vmatpush1.bf16.msra.mxu0 %v2739_v9 }
  0x4d   :  { %2044 = vmatpush1.bf16.msra.mxu1 %v2742_v13  ;;  %2014 = vmatprep.subr.bf16.mxu0 %v2746_v17 }
  0x4e   :  { %2046 = vmatprep.subr.bf16.mxu1 %v2748_v18  ;;  %399 = vmatprep.mubr.f32.mxu0 %v2674_v0 }
  0x4f   :  { %470 = vmatprep.mubr.f32.mxu1 %v2674_v0 }
  0x50   :  { %2016 = vmatpush1.bf16.msra.mxu0 %v2751_v22 }
  0x51   :  { %2048 = vmatpush1.bf16.msra.mxu1 %v2755_v26  ;;  %2018 = vmatprep.subr.bf16.mxu0 %v2757_v27 }
  0x52   :  { %2050 = vmatprep.subr.bf16.mxu1 %v2759_v31 }
  0x54   :  { %2020 = vmatpush1.bf16.msra.mxu0 %v2762_v35 }
  0x55   :  { %2052 = vmatpush1.bf16.msra.mxu1 %v2766_v39  ;;  %2022 = vmatprep.subr.bf16.mxu0 %v2768_v40 }
  0x56   :  { %2054 = vmatprep.subr.bf16.mxu1 %v2771_v44 }
  0x58   :  { %2024 = vmatpush1.bf16.msra.mxu0 %v2774_v51 }
  0x59   :  { %2056 = vmatpush1.bf16.msra.mxu1 %v2778_v52  ;;  %2026 = vmatprep.subr.bf16.mxu0 %v2780_v53 }
  0x5a   :  { %2058 = vmatprep.subr.bf16.mxu1 %v2783_v57 }
  0x5c   :  { %2028 = vmatpush1.bf16.msra.mxu0 %v2786_v63 }
  0x5d   :  { %2060 = vmatpush1.bf16.msra.mxu1 %v2790_v1  ;;  %2030 = vmatprep.subr.bf16.mxu0 %v2792_v2 }
  0x5e   :  { %2062 = vmatprep.subr.bf16.mxu1 %v2795_v7 }
  0x60   :  { %2032 = vmatpush1.bf16.msra.mxu0 %v2798_v16 }
  0x61   :  { %2064 = vmatpush1.bf16.msra.mxu1 %v2802_v19  ;;  %2034 = vmatprep.subr.bf16.mxu0 %v2804_v20 }
  0x62   :  { %2066 = vmatprep.subr.bf16.mxu1 %v2807_v25 }
  0x64   :  { %2036 = vmatpush1.bf16.msra.mxu0 %v2810_v34 }
  0x65   :  { %2068 = vmatpush1.bf16.msra.mxu1 %v2814_v36  ;;  %2038 = vmatprep.subr.bf16.mxu0 %v2816_v37 }
  0x66   :  { %2070 = vmatprep.subr.bf16.mxu1 %v2819_v42 }
  0x68   :  { %2040 = vmatpush1.bf16.msra.mxu0 %v2822_v46 }
  0x69   :  { %2072 = vmatpush1.bf16.msra.mxu1 %v2826_v47  ;;  %2074 = vmatprep.subr.bf16.mxu0 %v2735_v4 }
  0x6a   :  { %2106 = vmatprep.subr.bf16.mxu1 %v2737_v8 }
 0x11e   :  { %v183_v59 = vpop.f32.mrb[0].mxu0 }
 0x11f   :  { %v254_v62 = vpop.f32.mrb[0].mxu1  ;;  %v185_v3 = vpop.f32.mrb[1].mxu0 }
 0x120   :  { %v263_v6 = vcombine.low %v183_v59, %v185_v3  ;;  %v256_v10 = vpop.f32.mrb[1].mxu1 }
 0x121   :  { %v264_v11 = vcombine.low %v254_v62, %v256_v10  ;;  %v2886_v10 = vrot.slane %v113_v61, %v317_v58 }
 0x122   :  { %v271_v14 = vrot.slane %v263_v6, %v2870_v60 }
 0x123   :  { %v278_v21 = vrot.slane %v264_v11, %v2870_v60 }
 0x125   :  { %v279_v28 = vcombine.low %v271_v14, %v278_v21 }
 0x127   :  { %v281_v30 = vadd.f32 %v279_v28, %v116_v24 }
 0x129   :  { %v287_v33 = vadd.f32 %v286_v29, %v281_v30  ;;  %v300_v38 = vrot.slane %v281_v30, 2  ;;  %v309_v49 = vrot.slane %v281_v30, 6  ;;  %v320_v21 = vrot.slane %v281_v30, 4 }
 0x12b   :  { %v1917_v41 = vmul.f32 -1.442695, %v287_v33  ;;  %v302_v43 = vadd.f32 %v300_v38, %v298_v32 }
 0x12d   :  { %2468 = vpow2.f32 %v1917_v41  ;;  %v1918_v45 = vmul.f32 -1.442695, %v302_v43 }
 0x12f   :  { %2470 = vpow2.f32 %v1918_v45 }
 0x137   :  { %v2469_v48 = vpop.eup %2468 }
 0x138   :  { %v291_v50 = vadd.f32 1.0, %v2469_v48 }
 0x139   :  { %v2471_v54 = vpop.eup %2470 }
 0x13a   :  { %2472 = vrcp.f32 %v291_v50  ;;  %v306_v55 = vadd.f32 1.0, %v2471_v54  ;;  %v334_v50 = vld [vmem:[#allocation2 + $0x8] sm:$0xff] }
 0x13b   :  { %2474 = vtanh.f32 %v309_v49 }
 0x13c   :  { %2476 = vrcp.f32 %v306_v55 }
 0x144   :  { %v2473_v59 = vpop.eup %2472 }
 0x145   :  { %v2475_v62 = vpop.eup %2474 }
 0x146   :  { %v2477_v3 = vpop.eup %2476  ;;  %v313_v6 = vmul.f32 %v2475_v62, %v2473_v59 }
 0x147   :  { %v312_v5 = vmul.f32 %v2477_v3, %v115_v15 }
 0x149   :  { %v2888_v11 = vadd.f32 %v313_v6, %v312_v5 }
 0x14b   :  { %v319_v14 = vmul.f32 %v2886_v10, %v2888_v11  ;;  %332 = vst [vmem:[#allocation7 + $0x8] sm:$0x3] %v2888_v11  ;;  %v500_v58 = vmul.f32 %v2888_v11, %v2875_v12  ;;  %v508_v62 = vmul.f32 %v2888_v11, %v2882_v23 }
 0x14d   :  { %v322_v24 = vadd.f32 %v320_v21, %v319_v14 }
 0x14f   :  { %v1919_v28 = vmul.f32 -1.442695, %v322_v24 }
 0x151   :  { %2478 = vpow2.f32 %v1919_v28 }
 0x152   :  { %2480 = vtanh.f32 %v2888_v11 }
 0x15b   :  { %v2479_v29 = vpop.eup %2478 }
 0x15c   :  { %v326_v56 = vadd.f32 1.0, %v2479_v29  ;;  %v2481_v15 = vpop.eup %2480 }
 0x15e   :  { %2482 = vrcp.f32 %v326_v56 }
 0x168   :  { %v2483_v32 = vpop.eup %2482 }
 0x169   :  { %v330_v61 = vmul.f32 %v2483_v32, %v2481_v15 }
 0x16b   :  { %331 = vst [vmem:[#allocation7] sm:$0x3] %v330_v61  ;;  %400 = vmatmul.mubr.f32.vlgmr.msra.gmra.mrb[2].mxu0 %v330_v61  ;;  %471 = vmatmul.mubr.f32.vlgmr.msra.gmra.mrb[2].mxu1 %v330_v61 }
 0x16c   :  { %2076 = vmatpush1.bf16.msra.mxu0 %v2739_v9  ;;  %2108 = vmatpush1.bf16.msra.mxu1 %v2742_v13 }
 0x16d   :  { %2078 = vmatprep.subr.bf16.mxu0 %v2746_v17  ;;  %2110 = vmatprep.subr.bf16.mxu1 %v2748_v18 }
 0x16e   :  { %625 = vmatprep.mubr.f32.mxu0 %v2674_v0  ;;  %696 = vmatprep.mubr.f32.mxu1 %v2674_v0 }
 0x170   :  { %2080 = vmatpush1.bf16.msra.mxu0 %v2751_v22  ;;  %2112 = vmatpush1.bf16.msra.mxu1 %v2755_v26 }
 0x171   :  { %2082 = vmatprep.subr.bf16.mxu0 %v2757_v27  ;;  %2114 = vmatprep.subr.bf16.mxu1 %v2759_v31 }
 0x174   :  { %2084 = vmatpush1.bf16.msra.mxu0 %v2762_v35  ;;  %2116 = vmatpush1.bf16.msra.mxu1 %v2766_v39 }
 0x175   :  { %2086 = vmatprep.subr.bf16.mxu0 %v2768_v40  ;;  %2118 = vmatprep.subr.bf16.mxu1 %v2771_v44 }
 0x178   :  { %2088 = vmatpush1.bf16.msra.mxu0 %v2774_v51  ;;  %2120 = vmatpush1.bf16.msra.mxu1 %v2778_v52 }
 0x179   :  { %2090 = vmatprep.subr.bf16.mxu0 %v2780_v53  ;;  %2122 = vmatprep.subr.bf16.mxu1 %v2783_v57 }
 0x17c   :  { %2092 = vmatpush1.bf16.msra.mxu0 %v2786_v63  ;;  %2124 = vmatpush1.bf16.msra.mxu1 %v2790_v1 }
 0x17d   :  { %2094 = vmatprep.subr.bf16.mxu0 %v2792_v2  ;;  %2126 = vmatprep.subr.bf16.mxu1 %v2795_v7 }
 0x180   :  { %2096 = vmatpush1.bf16.msra.mxu0 %v2798_v16  ;;  %2128 = vmatpush1.bf16.msra.mxu1 %v2802_v19 }
 0x181   :  { %2098 = vmatprep.subr.bf16.mxu0 %v2804_v20  ;;  %2130 = vmatprep.subr.bf16.mxu1 %v2807_v25 }
 0x184   :  { %2100 = vmatpush1.bf16.msra.mxu0 %v2810_v34  ;;  %2132 = vmatpush1.bf16.msra.mxu1 %v2814_v36 }
 0x185   :  { %2102 = vmatprep.subr.bf16.mxu0 %v2816_v37  ;;  %2134 = vmatprep.subr.bf16.mxu1 %v2819_v42 }
 0x188   :  { %2104 = vmatpush1.bf16.msra.mxu0 %v2822_v46  ;;  %2136 = vmatpush1.bf16.msra.mxu1 %v2826_v47 }
 0x189   :  { %2138 = vmatprep.subr.bf16.mxu0 %v2735_v4  ;;  %2170 = vmatprep.subr.bf16.mxu1 %v2737_v8 }
 0x23e   :  { %v401_v30 = vpop.f32.mrb[2].mxu0  ;;  %v472_v33 = vpop.f32.mrb[2].mxu1 }
 0x23f   :  { %v403_v38 = vpop.f32.mrb[3].mxu0  ;;  %v474_v41 = vpop.f32.mrb[3].mxu1 }
 0x240   :  { %v481_v43 = vcombine.low %v401_v30, %v403_v38  ;;  %v482_v45 = vcombine.low %v472_v33, %v474_v41 }
 0x242   :  { %v489_v48 = vrot.slane %v481_v43, %v2870_v60  ;;  %v496_v49 = vrot.slane %v482_v45, %v2870_v60 }
 0x244   :  { %v497_v54 = vcombine.low %v489_v48, %v496_v49 }
 0x246   :  { %v499_v55 = vadd.f32 %v497_v54, %v334_v50 }
 0x248   :  { %v501_v59 = vadd.f32 %v500_v58, %v499_v55  ;;  %v510_v3 = vrot.slane %v499_v55, 2  ;;  %v519_v24 = vrot.slane %v499_v55, 6  ;;  %v526_v43 = vrot.slane %v499_v55, 4 }
 0x24a   :  { %v1920_v5 = vmul.f32 -1.442695, %v501_v59  ;;  %v512_v6 = vadd.f32 %v510_v3, %v508_v62 }
 0x24c   :  { %2484 = vpow2.f32 %v1920_v5  ;;  %v1921_v14 = vmul.f32 -1.442695, %v512_v6 }
 0x24e   :  { %2486 = vpow2.f32 %v1921_v14 }
 0x256   :  { %v2485_v21 = vpop.eup %2484 }
 0x257   :  { %v505_v28 = vadd.f32 1.0, %v2485_v21 }
 0x258   :  { %v2487_v29 = vpop.eup %2486 }
 0x259   :  { %2488 = vrcp.f32 %v505_v28  ;;  %v516_v56 = vadd.f32 1.0, %v2487_v29  ;;  %v560_v29 = vld [vmem:[#allocation2 + $0x10] sm:$0xff] }
 0x25a   :  { %2490 = vtanh.f32 %v519_v24 }
 0x25b   :  { %2492 = vrcp.f32 %v516_v56 }
 0x263   :  { %v2489_v15 = vpop.eup %2488 }
 0x264   :  { %v2491_v32 = vpop.eup %2490 }
 0x265   :  { %v2493_v61 = vpop.eup %2492  ;;  %v523_v33 = vmul.f32 %v2491_v32, %v2489_v15 }
 0x266   :  { %v522_v30 = vmul.f32 %v2493_v61, %v2888_v11 }
 0x268   :  { %v2935_v38 = vadd.f32 %v523_v33, %v522_v30 }
 0x26a   :  { %v525_v41 = vmul.f32 %v2935_v38, %v2886_v10  ;;  %v549_v45 = vcombine.low %v2935_v38, %v2935_v38  ;;  %v726_v32 = vmul.f32 %v2935_v38, %v2875_v12  ;;  %v734_v30 = vmul.f32 %v2935_v38, %v2882_v23 }
 0x26c   :  { %v528_v48 = vadd.f32 %v526_v43, %v525_v41  ;;  %1924 = vst.sshfl [vmem:[#allocation7 + $0x8] sm:$0x30 pattern:$0x76325410] %v549_v45 }
 0x26e   :  { %v1922_v49 = vmul.f32 -1.442695, %v528_v48 }
 0x270   :  { %2494 = vpow2.f32 %v1922_v49 }
 0x271   :  { %2496 = vtanh.f32 %v2935_v38 }
 0x27a   :  { %v2495_v50 = vpop.eup %2494 }
 0x27b   :  { %v532_v54 = vadd.f32 1.0, %v2495_v50  ;;  %v2497_v11 = vpop.eup %2496 }
 0x27d   :  { %2498 = vrcp.f32 %v532_v54 }
 0x287   :  { %v2499_v58 = vpop.eup %2498 }
 0x288   :  { %v536_v59 = vmul.f32 %v2499_v58, %v2497_v11 }
 0x28a   :  { %v538_v62 = vcombine.low %v536_v59, %v536_v59  ;;  %626 = vmatmul.mubr.f32.vlgmr.msra.gmra.mrb[4].mxu0 %v536_v59  ;;  %697 = vmatmul.mubr.f32.vlgmr.msra.gmra.mrb[4].mxu1 %v536_v59 }
 0x28b   :  { %2140 = vmatpush1.bf16.msra.mxu0 %v2739_v9  ;;  %2172 = vmatpush1.bf16.msra.mxu1 %v2742_v13 }
 0x28c   :  { %1923 = vst.sshfl [vmem:[#allocation7] sm:$0x30 pattern:$0x76325410] %v538_v62  ;;  %2142 = vmatprep.subr.bf16.mxu0 %v2746_v17  ;;  %2174 = vmatprep.subr.bf16.mxu1 %v2748_v18 }
 0x28d   :  { %851 = vmatprep.mubr.f32.mxu0 %v2674_v0  ;;  %922 = vmatprep.mubr.f32.mxu1 %v2674_v0 }
 0x28f   :  { %2144 = vmatpush1.bf16.msra.mxu0 %v2751_v22  ;;  %2176 = vmatpush1.bf16.msra.mxu1 %v2755_v26 }
 0x290   :  { %2146 = vmatprep.subr.bf16.mxu0 %v2757_v27  ;;  %2178 = vmatprep.subr.bf16.mxu1 %v2759_v31 }
 0x293   :  { %2148 = vmatpush1.bf16.msra.mxu0 %v2762_v35  ;;  %2180 = vmatpush1.bf16.msra.mxu1 %v2766_v39 }
 0x294   :  { %2150 = vmatprep.subr.bf16.mxu0 %v2768_v40  ;;  %2182 = vmatprep.subr.bf16.mxu1 %v2771_v44 }
 0x297   :  { %2152 = vmatpush1.bf16.msra.mxu0 %v2774_v51  ;;  %2184 = vmatpush1.bf16.msra.mxu1 %v2778_v52 }
 0x298   :  { %2154 = vmatprep.subr.bf16.mxu0 %v2780_v53  ;;  %2186 = vmatprep.subr.bf16.mxu1 %v2783_v57 }
 0x29b   :  { %2156 = vmatpush1.bf16.msra.mxu0 %v2786_v63  ;;  %2188 = vmatpush1.bf16.msra.mxu1 %v2790_v1 }
 0x29c   :  { %2158 = vmatprep.subr.bf16.mxu0 %v2792_v2  ;;  %2190 = vmatprep.subr.bf16.mxu1 %v2795_v7 }
 0x29f   :  { %2160 = vmatpush1.bf16.msra.mxu0 %v2798_v16  ;;  %2192 = vmatpush1.bf16.msra.mxu1 %v2802_v19 }
 0x2a0   :  { %2162 = vmatprep.subr.bf16.mxu0 %v2804_v20  ;;  %2194 = vmatprep.subr.bf16.mxu1 %v2807_v25 }
 0x2a3   :  { %2164 = vmatpush1.bf16.msra.mxu0 %v2810_v34  ;;  %2196 = vmatpush1.bf16.msra.mxu1 %v2814_v36 }
 0x2a4   :  { %2166 = vmatprep.subr.bf16.mxu0 %v2816_v37  ;;  %2198 = vmatprep.subr.bf16.mxu1 %v2819_v42 }
 0x2a7   :  { %2168 = vmatpush1.bf16.msra.mxu0 %v2822_v46  ;;  %2200 = vmatpush1.bf16.msra.mxu1 %v2826_v47 }
 0x2a8   :  { %2202 = vmatprep.subr.bf16.mxu0 %v2735_v4  ;;  %2234 = vmatprep.subr.bf16.mxu1 %v2737_v8 }
 0x35d   :  { %v627_v55 = vpop.f32.mrb[4].mxu0  ;;  %v698_v3 = vpop.f32.mrb[4].mxu1 }
 0x35e   :  { %v629_v5 = vpop.f32.mrb[5].mxu0  ;;  %v700_v6 = vpop.f32.mrb[5].mxu1 }
 0x35f   :  { %v707_v14 = vcombine.low %v627_v55, %v629_v5  ;;  %v708_v21 = vcombine.low %v698_v3, %v700_v6 }
 0x361   :  { %v715_v24 = vrot.slane %v707_v14, %v2870_v60  ;;  %v722_v28 = vrot.slane %v708_v21, %v2870_v60 }
 0x363   :  { %v723_v56 = vcombine.low %v715_v24, %v722_v28 }
 0x365   :  { %v725_v15 = vadd.f32 %v723_v56, %v560_v29 }
 0x367   :  { %v727_v61 = vadd.f32 %v726_v32, %v725_v15  ;;  %v736_v33 = vrot.slane %v725_v15, 2  ;;  %v745_v49 = vrot.slane %v725_v15, 6  ;;  %v752_v14 = vrot.slane %v725_v15, 4 }
 0x369   :  { %v1925_v41 = vmul.f32 -1.442695, %v727_v61  ;;  %v738_v43 = vadd.f32 %v736_v33, %v734_v30 }
 0x36b   :  { %2500 = vpow2.f32 %v1925_v41  ;;  %v1926_v45 = vmul.f32 -1.442695, %v738_v43 }
 0x36d   :  { %2502 = vpow2.f32 %v1926_v45 }
 0x375   :  { %v2501_v48 = vpop.eup %2500 }
 0x376   :  { %v731_v50 = vadd.f32 1.0, %v2501_v48 }
 0x377   :  { %v2503_v54 = vpop.eup %2502 }
 0x378   :  { %2504 = vrcp.f32 %v731_v50  ;;  %v742_v11 = vadd.f32 1.0, %v2503_v54 }
 0x379   :  { %2506 = vtanh.f32 %v745_v49 }
 0x37a   :  { %2508 = vrcp.f32 %v742_v11 }
 0x382   :  { %v2505_v58 = vpop.eup %2504 }
 0x383   :  { %v2507_v59 = vpop.eup %2506 }
 0x384   :  { %v2509_v62 = vpop.eup %2508  ;;  %v749_v3 = vmul.f32 %v2507_v59, %v2505_v58  ;;  %v786_v58 = vld [vmem:[#allocation2 + $0x18] sm:$0xff] }
 0x385   :  { %v748_v55 = vmul.f32 %v2509_v62, %v2935_v38 }
 0x387   :  { %v2983_v5 = vadd.f32 %v749_v3, %v748_v55 }
 0x389   :  { %v751_v6 = vmul.f32 %v2983_v5, %v2886_v10  ;;  %v781_v21 = vrot.slane %v2983_v5, %v2870_v60  ;;  %v952_v55 = vmul.f32 %v2983_v5, %v2875_v12 }
 0x38b   :  { %v754_v24 = vadd.f32 %v752_v14, %v751_v6  ;;  %v782_v28 = vcombine.low %v781_v21, %v781_v21  ;;  %v960_v6 = vmul.f32 %v2983_v5, %v2882_v23 }
 0x38d   :  { %v1927_v29 = vmul.f32 -1.442695, %v754_v24  ;;  %784 = vst [vmem:[#allocation7 + $0x8] sm:$0x30] %v782_v28 }
 0x38f   :  { %2510 = vpow2.f32 %v1927_v29 }
 0x390   :  { %2512 = vtanh.f32 %v2983_v5 }
 0x399   :  { %v2511_v56 = vpop.eup %2510 }
 0x39a   :  { %v758_v32 = vadd.f32 1.0, %v2511_v56  ;;  %v2513_v38 = vpop.eup %2512 }
 0x39c   :  { %2514 = vrcp.f32 %v758_v32 }
 0x3a6   :  { %v2515_v61 = vpop.eup %2514 }
 0x3a7   :  { %v762_v30 = vmul.f32 %v2515_v61, %v2513_v38 }
 0x3a9   :  { %v770_v33 = vrot.slane %v762_v30, %v2870_v60  ;;  %852 = vmatmul.mubr.f32.vlgmr.msra.gmra.mrb[6].mxu0 %v762_v30  ;;  %923 = vmatmul.mubr.f32.vlgmr.msra.gmra.mrb[6].mxu1 %v762_v30 }
 0x3aa   :  { %2204 = vmatpush1.bf16.msra.mxu0 %v2739_v9  ;;  %2236 = vmatpush1.bf16.msra.mxu1 %v2742_v13 }
 0x3ab   :  { %v771_v15 = vcombine.low %v770_v33, %v770_v33  ;;  %2206 = vmatprep.subr.bf16.mxu0 %v2746_v17  ;;  %2238 = vmatprep.subr.bf16.mxu1 %v2748_v18 }
 0x3ac   :  { %1079 = vmatprep.mubr.f32.mxu0 %v2674_v0  ;;  %1150 = vmatprep.mubr.f32.mxu1 %v2674_v0 }
 0x3ad   :  { %773 = vst [vmem:[#allocation7] sm:$0x30] %v771_v15 }
 0x3ae   :  { %2208 = vmatpush1.bf16.msra.mxu0 %v2751_v22  ;;  %2240 = vmatpush1.bf16.msra.mxu1 %v2755_v26 }
 0x3af   :  { %2210 = vmatprep.subr.bf16.mxu0 %v2757_v27  ;;  %2242 = vmatprep.subr.bf16.mxu1 %v2759_v31 }
 0x3b2   :  { %2212 = vmatpush1.bf16.msra.mxu0 %v2762_v35  ;;  %2244 = vmatpush1.bf16.msra.mxu1 %v2766_v39 }
 0x3b3   :  { %2214 = vmatprep.subr.bf16.mxu0 %v2768_v40  ;;  %2246 = vmatprep.subr.bf16.mxu1 %v2771_v44 }
 0x3b6   :  { %2216 = vmatpush1.bf16.msra.mxu0 %v2774_v51  ;;  %2248 = vmatpush1.bf16.msra.mxu1 %v2778_v52 }
 0x3b7   :  { %2218 = vmatprep.subr.bf16.mxu0 %v2780_v53  ;;  %2250 = vmatprep.subr.bf16.mxu1 %v2783_v57 }
 0x3ba   :  { %2220 = vmatpush1.bf16.msra.mxu0 %v2786_v63  ;;  %2252 = vmatpush1.bf16.msra.mxu1 %v2790_v1 }
 0x3bb   :  { %2222 = vmatprep.subr.bf16.mxu0 %v2792_v2  ;;  %2254 = vmatprep.subr.bf16.mxu1 %v2795_v7 }
 0x3be   :  { %2224 = vmatpush1.bf16.msra.mxu0 %v2798_v16  ;;  %2256 = vmatpush1.bf16.msra.mxu1 %v2802_v19 }
 0x3bf   :  { %2226 = vmatprep.subr.bf16.mxu0 %v2804_v20  ;;  %2258 = vmatprep.subr.bf16.mxu1 %v2807_v25 }
 0x3c2   :  { %2228 = vmatpush1.bf16.msra.mxu0 %v2810_v34  ;;  %2260 = vmatpush1.bf16.msra.mxu1 %v2814_v36 }
 0x3c3   :  { %2230 = vmatprep.subr.bf16.mxu0 %v2816_v37  ;;  %2262 = vmatprep.subr.bf16.mxu1 %v2819_v42 }
 0x3c6   :  { %2232 = vmatpush1.bf16.msra.mxu0 %v2822_v46  ;;  %2264 = vmatpush1.bf16.msra.mxu1 %v2826_v47 }
 0x3c7   :  { %2266 = vmatprep.subr.bf16.mxu0 %v2735_v4  ;;  %2298 = vmatprep.subr.bf16.mxu1 %v2737_v8 }
 0x47c   :  { %v853_v41 = vpop.f32.mrb[6].mxu0  ;;  %v924_v43 = vpop.f32.mrb[6].mxu1 }
 0x47d   :  { %v855_v45 = vpop.f32.mrb[7].mxu0  ;;  %v926_v48 = vpop.f32.mrb[7].mxu1 }
 0x47e   :  { %v933_v49 = vcombine.low %v853_v41, %v855_v45  ;;  %v934_v50 = vcombine.low %v924_v43, %v926_v48 }
 0x480   :  { %v941_v54 = vrot.slane %v933_v49, %v2870_v60  ;;  %v948_v11 = vrot.slane %v934_v50, %v2870_v60 }
 0x482   :  { %v949_v59 = vcombine.low %v941_v54, %v948_v11 }
 0x484   :  { %v951_v62 = vadd.f32 %v949_v59, %v786_v58 }
 0x486   :  { %v953_v3 = vadd.f32 %v952_v55, %v951_v62  ;;  %v962_v14 = vrot.slane %v951_v62, 2  ;;  %v971_v56 = vrot.slane %v951_v62, 6  ;;  %v978_v49 = vrot.slane %v951_v62, 4 }
 0x488   :  { %v1928_v21 = vmul.f32 -1.442695, %v953_v3  ;;  %v964_v24 = vadd.f32 %v962_v14, %v960_v6 }
 0x48a   :  { %2516 = vpow2.f32 %v1928_v21  ;;  %v1929_v28 = vmul.f32 -1.442695, %v964_v24 }
 0x48c   :  { %2518 = vpow2.f32 %v1929_v28 }
 0x494   :  { %v2517_v29 = vpop.eup %2516 }
 0x495   :  { %v957_v32 = vadd.f32 1.0, %v2517_v29 }
 0x496   :  { %v2519_v38 = vpop.eup %2518 }
 0x497   :  { %2520 = vrcp.f32 %v957_v32  ;;  %v968_v61 = vadd.f32 1.0, %v2519_v38 }
 0x498   :  { %2522 = vtanh.f32 %v971_v56 }
 0x499   :  { %2524 = vrcp.f32 %v968_v61 }
 0x4a1   :  { %v2521_v30 = vpop.eup %2520 }
 0x4a2   :  { %v2523_v33 = vpop.eup %2522 }
 0x4a3   :  { %v2525_v15 = vpop.eup %2524  ;;  %v975_v43 = vmul.f32 %v2523_v33, %v2521_v30 }
 0x4a4   :  { %v974_v41 = vmul.f32 %v2525_v15, %v2983_v5  ;;  %v1014_v15 = vld [vmem:[#allocation2 + $0x20] sm:$0xff] }
 0x4a6   :  { %v3032_v45 = vadd.f32 %v975_v43, %v974_v41 }
 0x4a8   :  { %v977_v48 = vmul.f32 %v3032_v45, %v2886_v10  ;;  %v1002_v50 = vcombine.low %v3032_v45, %v3032_v45 }
 0x4aa   :  { %v980_v54 = vadd.f32 %v978_v49, %v977_v48  ;;  %v1009_v11 = vrot.slane %v1002_v50, %v2870_v60  ;;  %v1180_v48 = vmul.f32 %v3032_v45, %v2875_v12  ;;  %v1188_v50 = vmul.f32 %v3032_v45, %v2882_v23 }
 0x4ac   :  { %v1930_v58 = vmul.f32 -1.442695, %v980_v54  ;;  %v1010_v59 = vcombine.low %v1009_v11, %v1009_v11 }
 0x4ae   :  { %2526 = vpow2.f32 %v1930_v58  ;;  %1012 = vst [vmem:[#allocation7 + $0x8] sm:$0xc0] %v1010_v59 }
 0x4af   :  { %2528 = vtanh.f32 %v3032_v45 }
 0x4b8   :  { %v2527_v55 = vpop.eup %2526 }
 0x4b9   :  { %v984_v3 = vadd.f32 1.0, %v2527_v55  ;;  %v2529_v5 = vpop.eup %2528 }
 0x4bb   :  { %2530 = vrcp.f32 %v984_v3 }
 0x4c5   :  { %v2531_v6 = vpop.eup %2530 }
 0x4c6   :  { %v988_v14 = vmul.f32 %v2531_v6, %v2529_v5 }
 0x4c8   :  { %v990_v21 = vcombine.low %v988_v14, %v988_v14  ;;  %1080 = vmatmul.mubr.f32.vlgmr.msra.gmra.mrb[8].mxu0 %v988_v14  ;;  %1151 = vmatmul.mubr.f32.vlgmr.msra.gmra.mrb[8].mxu1 %v988_v14 }
 0x4c9   :  { %2268 = vmatpush1.bf16.msra.mxu0 %v2739_v9  ;;  %2300 = vmatpush1.bf16.msra.mxu1 %v2742_v13 }
 0x4ca   :  { %v997_v62 = vrot.slane %v990_v21, %v2870_v60  ;;  %2270 = vmatprep.subr.bf16.mxu0 %v2746_v17  ;;  %2302 = vmatprep.subr.bf16.mxu1 %v2748_v18 }
 0x4cb   :  { %1285 = vmatprep.mubr.f32.mxu0 %v2674_v0  ;;  %1356 = vmatprep.mubr.f32.mxu1 %v2674_v0 }
 0x4cc   :  { %v998_v24 = vcombine.low %v997_v62, %v997_v62 }
 0x4cd   :  { %2272 = vmatpush1.bf16.msra.mxu0 %v2751_v22  ;;  %2304 = vmatpush1.bf16.msra.mxu1 %v2755_v26 }
 0x4ce   :  { %1000 = vst [vmem:[#allocation7] sm:$0xc0] %v998_v24  ;;  %2274 = vmatprep.subr.bf16.mxu0 %v2757_v27  ;;  %2306 = vmatprep.subr.bf16.mxu1 %v2759_v31 }
 0x4d1   :  { %2276 = vmatpush1.bf16.msra.mxu0 %v2762_v35  ;;  %2308 = vmatpush1.bf16.msra.mxu1 %v2766_v39 }
 0x4d2   :  { %2278 = vmatprep.subr.bf16.mxu0 %v2768_v40  ;;  %2310 = vmatprep.subr.bf16.mxu1 %v2771_v44 }
 0x4d5   :  { %2280 = vmatpush1.bf16.msra.mxu0 %v2774_v51  ;;  %2312 = vmatpush1.bf16.msra.mxu1 %v2778_v52 }
 0x4d6   :  { %2282 = vmatprep.subr.bf16.mxu0 %v2780_v53  ;;  %2314 = vmatprep.subr.bf16.mxu1 %v2783_v57 }
 0x4d9   :  { %2284 = vmatpush1.bf16.msra.mxu0 %v2786_v63  ;;  %2316 = vmatpush1.bf16.msra.mxu1 %v2790_v1 }
 0x4da   :  { %2286 = vmatprep.subr.bf16.mxu0 %v2792_v2  ;;  %2318 = vmatprep.subr.bf16.mxu1 %v2795_v7 }
 0x4dd   :  { %2288 = vmatpush1.bf16.msra.mxu0 %v2798_v16  ;;  %2320 = vmatpush1.bf16.msra.mxu1 %v2802_v19 }
 0x4de   :  { %2290 = vmatprep.subr.bf16.mxu0 %v2804_v20  ;;  %2322 = vmatprep.subr.bf16.mxu1 %v2807_v25 }
 0x4e1   :  { %2292 = vmatpush1.bf16.msra.mxu0 %v2810_v34  ;;  %2324 = vmatpush1.bf16.msra.mxu1 %v2814_v36 }
 0x4e2   :  { %2294 = vmatprep.subr.bf16.mxu0 %v2816_v37  ;;  %2326 = vmatprep.subr.bf16.mxu1 %v2819_v42 }
 0x4e5   :  { %2296 = vmatpush1.bf16.msra.mxu0 %v2822_v46  ;;  %2328 = vmatpush1.bf16.msra.mxu1 %v2826_v47 }
 0x4e6   :  { %2330 = vmatprep.subr.bf16.mxu0 %v2735_v4  ;;  %2362 = vmatprep.subr.bf16.mxu1 %v2737_v8 }
 0x59b   :  { %v1081_v28 = vpop.f32.mrb[8].mxu0  ;;  %v1152_v29 = vpop.f32.mrb[8].mxu1 }
 0x59c   :  { %v1083_v56 = vpop.f32.mrb[9].mxu0  ;;  %v1154_v32 = vpop.f32.mrb[9].mxu1 }
 0x59d   :  { %v1161_v38 = vcombine.low %v1081_v28, %v1083_v56  ;;  %v1162_v61 = vcombine.low %v1152_v29, %v1154_v32 }
 0x59f   :  { %v1169_v30 = vrot.slane %v1161_v38, %v2870_v60  ;;  %v1176_v33 = vrot.slane %v1162_v61, %v2870_v60 }
 0x5a1   :  { %v1177_v41 = vcombine.low %v1169_v30, %v1176_v33 }
 0x5a3   :  { %v1179_v43 = vadd.f32 %v1177_v41, %v1014_v15 }
 0x5a5   :  { %v1181_v49 = vadd.f32 %v1180_v48, %v1179_v43  ;;  %v1190_v54 = vrot.slane %v1179_v43, 2  ;;  %v1199_v3 = vrot.slane %v1179_v43, 6  ;;  %v1206_v38 = vrot.slane %v1179_v43, 4 }
 0x5a7   :  { %v1931_v11 = vmul.f32 -1.442695, %v1181_v49  ;;  %v1192_v58 = vadd.f32 %v1190_v54, %v1188_v50 }
 0x5a9   :  { %2532 = vpow2.f32 %v1931_v11  ;;  %v1932_v59 = vmul.f32 -1.442695, %v1192_v58 }
 0x5ab   :  { %2534 = vpow2.f32 %v1932_v59 }
 0x5b3   :  { %v2533_v55 = vpop.eup %2532 }
 0x5b4   :  { %v1185_v5 = vadd.f32 1.0, %v2533_v55 }
 0x5b5   :  { %v2535_v6 = vpop.eup %2534 }
 0x5b6   :  { %2536 = vrcp.f32 %v1185_v5  ;;  %v1196_v14 = vadd.f32 1.0, %v2535_v6 }
 0x5b7   :  { %2538 = vtanh.f32 %v1199_v3  ;;  %v1220_v3 = vld [vmem:[#allocation2 + $0x28] sm:$0xff] }
 0x5b8   :  { %2540 = vrcp.f32 %v1196_v14 }
 0x5c0   :  { %v2537_v21 = vpop.eup %2536 }
 0x5c1   :  { %v2539_v62 = vpop.eup %2538 }
 0x5c2   :  { %v2541_v24 = vpop.eup %2540  ;;  %v1203_v29 = vmul.f32 %v2539_v62, %v2537_v21 }
 0x5c3   :  { %v1202_v28 = vmul.f32 %v2541_v24, %v3032_v45 }
 0x5c5   :  { %v3082_v56 = vadd.f32 %v1203_v29, %v1202_v28 }
 0x5c7   :  { %v1205_v32 = vmul.f32 %v3082_v56, %v2886_v10  ;;  %1218 = vst [vmem:[#allocation7 + $0x18] sm:$0x3] %v3082_v56  ;;  %v1386_v14 = vmul.f32 %v3082_v56, %v2875_v12 }
 0x5c9   :  { %v1208_v61 = vadd.f32 %v1206_v38, %v1205_v32 }
 0x5cb   :  { %v1933_v30 = vmul.f32 -1.442695, %v1208_v61 }
 0x5cd   :  { %2542 = vpow2.f32 %v1933_v30 }
 0x5ce   :  { %2544 = vtanh.f32 %v3082_v56 }
 0x5d7   :  { %v2543_v33 = vpop.eup %2542 }
 0x5d8   :  { %v1212_v15 = vadd.f32 1.0, %v2543_v33  ;;  %v2545_v41 = vpop.eup %2544 }
 0x5da   :  { %2546 = vrcp.f32 %v1212_v15 }
 0x5e4   :  { %v2547_v48 = vpop.eup %2546 }
 0x5e5   :  { %v1216_v45 = vmul.f32 %v2547_v48, %v2545_v41 }
 0x5e7   :  { %1217 = vst [vmem:[#allocation7 + $0x10] sm:$0x3] %v1216_v45  ;;  %1286 = vmatmul.mubr.f32.vlgmr.msra.gmra.mrb[10].mxu0 %v1216_v45  ;;  %1357 = vmatmul.mubr.f32.vlgmr.msra.gmra.mrb[10].mxu1 %v1216_v45 }
 0x5e8   :  { %2332 = vmatpush1.bf16.msra.mxu0 %v2739_v9  ;;  %2364 = vmatpush1.bf16.msra.mxu1 %v2742_v13 }
 0x5e9   :  { %2334 = vmatprep.subr.bf16.mxu0 %v2746_v17  ;;  %2366 = vmatprep.subr.bf16.mxu1 %v2748_v18 }
 0x5ea   :  { %1511 = vmatprep.mubr.f32.mxu0 %v2674_v0  ;;  %1582 = vmatprep.mubr.f32.mxu1 %v2674_v0 }
 0x5ec   :  { %2336 = vmatpush1.bf16.msra.mxu0 %v2751_v22  ;;  %2368 = vmatpush1.bf16.msra.mxu1 %v2755_v26 }
 0x5ed   :  { %2338 = vmatprep.subr.bf16.mxu0 %v2757_v27  ;;  %2370 = vmatprep.subr.bf16.mxu1 %v2759_v31 }
 0x5f0   :  { %2340 = vmatpush1.bf16.msra.mxu0 %v2762_v35  ;;  %2372 = vmatpush1.bf16.msra.mxu1 %v2766_v39 }
 0x5f1   :  { %2342 = vmatprep.subr.bf16.mxu0 %v2768_v40  ;;  %2374 = vmatprep.subr.bf16.mxu1 %v2771_v44 }
 0x5f4   :  { %2344 = vmatpush1.bf16.msra.mxu0 %v2774_v51  ;;  %2376 = vmatpush1.bf16.msra.mxu1 %v2778_v52 }
 0x5f5   :  { %2346 = vmatprep.subr.bf16.mxu0 %v2780_v53  ;;  %2378 = vmatprep.subr.bf16.mxu1 %v2783_v57 }
 0x5f8   :  { %2348 = vmatpush1.bf16.msra.mxu0 %v2786_v63  ;;  %2380 = vmatpush1.bf16.msra.mxu1 %v2790_v1 }
 0x5f9   :  { %2350 = vmatprep.subr.bf16.mxu0 %v2792_v2  ;;  %2382 = vmatprep.subr.bf16.mxu1 %v2795_v7 }
 0x5fc   :  { %2352 = vmatpush1.bf16.msra.mxu0 %v2798_v16  ;;  %2384 = vmatpush1.bf16.msra.mxu1 %v2802_v19 }
 0x5fd   :  { %2354 = vmatprep.subr.bf16.mxu0 %v2804_v20  ;;  %2386 = vmatprep.subr.bf16.mxu1 %v2807_v25 }
 0x600   :  { %2356 = vmatpush1.bf16.msra.mxu0 %v2810_v34  ;;  %2388 = vmatpush1.bf16.msra.mxu1 %v2814_v36 }
 0x601   :  { %2358 = vmatprep.subr.bf16.mxu0 %v2816_v37  ;;  %2390 = vmatprep.subr.bf16.mxu1 %v2819_v42 }
 0x604   :  { %2360 = vmatpush1.bf16.msra.mxu0 %v2822_v46  ;;  %2392 = vmatpush1.bf16.msra.mxu1 %v2826_v47 }
 0x605   :  { %2394 = vmatprep.subr.bf16.mxu0 %v2735_v4  ;;  %2426 = vmatprep.subr.bf16.mxu1 %v2737_v8  ;;  %v1394_v4 = vmul.f32 %v3082_v56, %v2882_v23 }
 0x6ba   :  { %v1287_v43 = vpop.f32.mrb[10].mxu0  ;;  %v1358_v49 = vpop.f32.mrb[10].mxu1 }
 0x6bb   :  { %v1289_v50 = vpop.f32.mrb[11].mxu0  ;;  %v1360_v54 = vpop.f32.mrb[11].mxu1 }
 0x6bc   :  { %v1367_v11 = vcombine.low %v1287_v43, %v1289_v50  ;;  %v1368_v58 = vcombine.low %v1358_v49, %v1360_v54 }
 0x6be   :  { %v1375_v59 = vrot.slane %v1367_v11, %v2870_v60  ;;  %v1382_v55 = vrot.slane %v1368_v58, %v2870_v60 }
 0x6c0   :  { %v1383_v5 = vcombine.low %v1375_v59, %v1382_v55 }
 0x6c2   :  { %v1385_v6 = vadd.f32 %v1383_v5, %v1220_v3 }
 0x6c4   :  { %v1387_v21 = vadd.f32 %v1386_v14, %v1385_v6  ;;  %v1396_v8 = vrot.slane %v1385_v6, 2  ;;  %v1405_v32 = vrot.slane %v1385_v6, 6  ;;  %v1412_v50 = vrot.slane %v1385_v6, 4 }
 0x6c6   :  { %v1934_v62 = vmul.f32 -1.442695, %v1387_v21  ;;  %v1398_v24 = vadd.f32 %v1396_v8, %v1394_v4 }
 0x6c8   :  { %2548 = vpow2.f32 %v1934_v62  ;;  %v1935_v28 = vmul.f32 -1.442695, %v1398_v24 }
 0x6ca   :  { %2550 = vpow2.f32 %v1935_v28 }
 0x6d2   :  { %v2549_v29 = vpop.eup %2548 }
 0x6d3   :  { %v1391_v38 = vadd.f32 1.0, %v2549_v29 }
 0x6d4   :  { %v2551_v61 = vpop.eup %2550 }
 0x6d5   :  { %2552 = vrcp.f32 %v1391_v38  ;;  %v1402_v30 = vadd.f32 1.0, %v2551_v61 }
 0x6d6   :  { %2554 = vtanh.f32 %v1405_v32 }
 0x6d7   :  { %2556 = vrcp.f32 %v1402_v30 }
 0x6df   :  { %v2553_v33 = vpop.eup %2552 }
 0x6e0   :  { %v2555_v15 = vpop.eup %2554 }
 0x6e1   :  { %v2557_v41 = vpop.eup %2556  ;;  %v1409_v45 = vmul.f32 %v2555_v15, %v2553_v33 }
 0x6e2   :  { %v1408_v48 = vmul.f32 %v2557_v41, %v3082_v56 }
 0x6e4   :  { %v3129_v43 = vadd.f32 %v1409_v45, %v1408_v48 }
 0x6e6   :  { %v1411_v49 = vmul.f32 %v3129_v43, %v2886_v10  ;;  %v1435_v54 = vcombine.low %v3129_v43, %v3129_v43 }
 0x6e8   :  { %v1414_v11 = vadd.f32 %v1412_v50, %v1411_v49  ;;  %1938 = vst.sshfl [vmem:[#allocation7 + $0x18] sm:$0x30 pattern:$0x76325410] %v1435_v54  ;;  %v1672_v50 = vld [vmem:[#allocation2 + $0x38] sm:$0xff] }
 0x6ea   :  { %v1936_v58 = vmul.f32 -1.442695, %v1414_v11 }
 0x6ec   :  { %2558 = vpow2.f32 %v1936_v58 }
 0x6ed   :  { %2560 = vtanh.f32 %v3129_v43 }
 0x6f6   :  { %v2559_v59 = vpop.eup %2558 }
 0x6f7   :  { %v1418_v55 = vadd.f32 1.0, %v2559_v59  ;;  %v2561_v56 = vpop.eup %2560 }
 0x6f9   :  { %2562 = vrcp.f32 %v1418_v55 }
 0x703   :  { %v2563_v3 = vpop.eup %2562 }
 0x704   :  { %v1422_v5 = vmul.f32 %v2563_v3, %v2561_v56 }
 0x706   :  { %v1424_v14 = vcombine.low %v1422_v5, %v1422_v5  ;;  %1512 = vmatmul.mubr.f32.vlgmr.msra.gmra.mrb[12].mxu0 %v1422_v5  ;;  %1583 = vmatmul.mubr.f32.vlgmr.msra.gmra.mrb[12].mxu1 %v1422_v5 }
 0x707   :  { %2396 = vmatpush1.bf16.msra.mxu0 %v2739_v9  ;;  %2428 = vmatpush1.bf16.msra.mxu1 %v2742_v13 }
 0x708   :  { %1937 = vst.sshfl [vmem:[#allocation7 + $0x10] sm:$0x30 pattern:$0x76325410] %v1424_v14  ;;  %2398 = vmatprep.subr.bf16.mxu0 %v2746_v17  ;;  %2430 = vmatprep.subr.bf16.mxu1 %v2748_v18 }
 0x709   :  { %1737 = vmatprep.mubr.f32.mxu0 %v2674_v0  ;;  %1808 = vmatprep.mubr.f32.mxu1 %v2674_v0 }
 0x70b   :  { %2400 = vmatpush1.bf16.msra.mxu0 %v2751_v22  ;;  %2432 = vmatpush1.bf16.msra.mxu1 %v2755_v26 }
 0x70c   :  { %2402 = vmatprep.subr.bf16.mxu0 %v2757_v27  ;;  %2434 = vmatprep.subr.bf16.mxu1 %v2759_v31  ;;  %v1446_v31 = vld [vmem:[#allocation2 + $0x30] sm:$0xff] }
 0x70f   :  { %2404 = vmatpush1.bf16.msra.mxu0 %v2762_v35  ;;  %2436 = vmatpush1.bf16.msra.mxu1 %v2766_v39 }
 0x710   :  { %2406 = vmatprep.subr.bf16.mxu0 %v2768_v40  ;;  %2438 = vmatprep.subr.bf16.mxu1 %v2771_v44  ;;  %v1612_v40 = vmul.f32 %v3129_v43, %v2875_v12 }
 0x713   :  { %2408 = vmatpush1.bf16.msra.mxu0 %v2774_v51  ;;  %2440 = vmatpush1.bf16.msra.mxu1 %v2778_v52  ;;  %v1620_v51 = vmul.f32 %v3129_v43, %v2882_v23 }
 0x714   :  { %2410 = vmatprep.subr.bf16.mxu0 %v2780_v53  ;;  %2442 = vmatprep.subr.bf16.mxu1 %v2783_v57 }
 0x717   :  { %2412 = vmatpush1.bf16.msra.mxu0 %v2786_v63  ;;  %2444 = vmatpush1.bf16.msra.mxu1 %v2790_v1 }
 0x718   :  { %2414 = vmatprep.subr.bf16.mxu0 %v2792_v2  ;;  %2446 = vmatprep.subr.bf16.mxu1 %v2795_v7 }
 0x71b   :  { %2416 = vmatpush1.bf16.msra.mxu0 %v2798_v16  ;;  %2448 = vmatpush1.bf16.msra.mxu1 %v2802_v19 }
 0x71c   :  { %2418 = vmatprep.subr.bf16.mxu0 %v2804_v20  ;;  %2450 = vmatprep.subr.bf16.mxu1 %v2807_v25 }
 0x71f   :  { %2420 = vmatpush1.bf16.msra.mxu0 %v2810_v34  ;;  %2452 = vmatpush1.bf16.msra.mxu1 %v2814_v36 }
 0x720   :  { %2422 = vmatprep.subr.bf16.mxu0 %v2816_v37  ;;  %2454 = vmatprep.subr.bf16.mxu1 %v2819_v42 }
 0x723   :  { %2424 = vmatpush1.bf16.msra.mxu0 %v2822_v46  ;;  %2456 = vmatpush1.bf16.msra.mxu1 %v2826_v47 }
 0x7d9   :  { %v1513_v0 = vpop.f32.mrb[12].mxu0  ;;  %v1584_v9 = vpop.f32.mrb[12].mxu1 }
 0x7da   :  { %v1515_v13 = vpop.f32.mrb[13].mxu0  ;;  %v1586_v17 = vpop.f32.mrb[13].mxu1 }
 0x7db   :  { %v1593_v18 = vcombine.low %v1513_v0, %v1515_v13  ;;  %v1594_v22 = vcombine.low %v1584_v9, %v1586_v17 }
 0x7dd   :  { %v1601_v26 = vrot.slane %v1593_v18, %v2870_v60  ;;  %v1608_v27 = vrot.slane %v1594_v22, %v2870_v60 }
 0x7df   :  { %v1609_v35 = vcombine.low %v1601_v26, %v1608_v27 }
 0x7e1   :  { %v1611_v39 = vadd.f32 %v1609_v35, %v1446_v31 }
 0x7e3   :  { %v1613_v44 = vadd.f32 %v1612_v40, %v1611_v39  ;;  %v1622_v52 = vrot.slane %v1611_v39, 2  ;;  %v1631_v2 = vrot.slane %v1611_v39, 6  ;;  %v1638_v47 = vrot.slane %v1611_v39, 4 }
 0x7e5   :  { %v1939_v53 = vmul.f32 -1.442695, %v1613_v44  ;;  %v1624_v57 = vadd.f32 %v1622_v52, %v1620_v51 }
 0x7e7   :  { %2564 = vpow2.f32 %v1939_v53  ;;  %v1940_v63 = vmul.f32 -1.442695, %v1624_v57 }
 0x7e9   :  { %2566 = vpow2.f32 %v1940_v63 }
 0x7f1   :  { %v2565_v1 = vpop.eup %2564 }
 0x7f2   :  { %v1617_v7 = vadd.f32 1.0, %v2565_v1 }
 0x7f3   :  { %v2567_v16 = vpop.eup %2566 }
 0x7f4   :  { %2568 = vrcp.f32 %v1617_v7  ;;  %v1628_v19 = vadd.f32 1.0, %v2567_v16 }
 0x7f5   :  { %2570 = vtanh.f32 %v1631_v2 }
 0x7f6   :  { %2572 = vrcp.f32 %v1628_v19 }
 0x7fe   :  { %v2569_v20 = vpop.eup %2568 }
 0x7ff   :  { %v2571_v25 = vpop.eup %2570 }
 0x800   :  { %v2573_v34 = vpop.eup %2572  ;;  %v1635_v37 = vmul.f32 %v2571_v25, %v2569_v20 }
 0x801   :  { %v1634_v36 = vmul.f32 %v2573_v34, %v3129_v43 }
 0x803   :  { %v1636_v42 = vadd.f32 %v1635_v37, %v1634_v36 }
 0x805   :  { %v1637_v46 = vmul.f32 %v1636_v42, %v2886_v10  ;;  %v1667_v6 = vrot.slane %v1636_v42, %v2870_v60  ;;  %v1838_v58 = vmul.f32 %v1636_v42, %v2875_v12  ;;  %v1846_v55 = vmul.f32 %v1636_v42, %v2882_v23 }
 0x807   :  { %v1640_v21 = vadd.f32 %v1638_v47, %v1637_v46  ;;  %v1668_v4 = vcombine.low %v1667_v6, %v1667_v6 }
 0x809   :  { %v1941_v8 = vmul.f32 -1.442695, %v1640_v21  ;;  %1670 = vst [vmem:[#allocation7 + $0x18] sm:$0x30] %v1668_v4 }
 0x80b   :  { %2574 = vpow2.f32 %v1941_v8 }
 0x80c   :  { %2576 = vtanh.f32 %v1636_v42 }
 0x815   :  { %v2575_v62 = vpop.eup %2574 }
 0x816   :  { %v1644_v24 = vadd.f32 1.0, %v2575_v62  ;;  %v2577_v28 = vpop.eup %2576 }
 0x818   :  { %2578 = vrcp.f32 %v1644_v24 }
 0x822   :  { %v2579_v29 = vpop.eup %2578 }
 0x823   :  { %v1648_v32 = vmul.f32 %v2579_v29, %v2577_v28 }
 0x825   :  { %v1656_v38 = vrot.slane %v1648_v32, %v2870_v60  ;;  %1738 = vmatmul.mubr.f32.vlgmr.msra.gmra.mrb[14].mxu0 %v1648_v32  ;;  %1809 = vmatmul.mubr.f32.vlgmr.msra.gmra.mrb[14].mxu1 %v1648_v32 }
 0x827   :  { %v1657_v61 = vcombine.low %v1656_v38, %v1656_v38 }
 0x829   :  { %1659 = vst [vmem:[#allocation7 + $0x10] sm:$0x30] %v1657_v61 }
 0x8f8   :  { %v1739_v30 = vpop.f32.mrb[14].mxu0  ;;  %v1810_v33 = vpop.f32.mrb[14].mxu1 }
 0x8f9   :  { %v1741_v15 = vpop.f32.mrb[15].mxu0  ;;  %v1812_v41 = vpop.f32.mrb[15].mxu1 }
 0x8fa   :  { %v1819_v48 = vcombine.low %v1739_v30, %v1741_v15  ;;  %v1820_v45 = vcombine.low %v1810_v33, %v1812_v41 }
 0x8fc   :  { %v1827_v43 = vrot.slane %v1819_v48, %v2870_v60  ;;  %v1834_v49 = vrot.slane %v1820_v45, %v2870_v60 }
 0x8fe   :  { %v1835_v54 = vcombine.low %v1827_v43, %v1834_v49 }
 0x900   :  { %v1837_v11 = vadd.f32 %v1835_v54, %v1672_v50 }
 0x902   :  { %v1839_v59 = vadd.f32 %v1838_v58, %v1837_v11  ;;  %v1848_v56 = vrot.slane %v1837_v11, 2  ;;  %v1857_v9 = vrot.slane %v1837_v11, 6  ;;  %v1864_v39 = vrot.slane %v1837_v11, 4 }
 0x904   :  { %v1942_v3 = vmul.f32 -1.442695, %v1839_v59  ;;  %v1850_v5 = vadd.f32 %v1848_v56, %v1846_v55 }
 0x906   :  { %2580 = vpow2.f32 %v1942_v3  ;;  %v1943_v14 = vmul.f32 -1.442695, %v1850_v5 }
 0x908   :  { %2582 = vpow2.f32 %v1943_v14 }
 0x910   :  { %v2581_v0 = vpop.eup %2580 }
 0x911   :  { %v1843_v13 = vadd.f32 1.0, %v2581_v0 }
 0x912   :  { %v2583_v17 = vpop.eup %2582 }
 0x913   :  { %2584 = vrcp.f32 %v1843_v13  ;;  %v1854_v18 = vadd.f32 1.0, %v2583_v17 }
 0x914   :  { %2586 = vtanh.f32 %v1857_v9 }
 0x915   :  { %2588 = vrcp.f32 %v1854_v18 }
 0x91d   :  { %v2585_v22 = vpop.eup %2584 }
 0x91e   :  { %v2587_v26 = vpop.eup %2586 }
 0x91f   :  { %v2589_v12 = vpop.eup %2588  ;;  %v1861_v31 = vmul.f32 %v2587_v26, %v2585_v22 }
 0x920   :  { %v1860_v27 = vmul.f32 %v2589_v12, %v1636_v42 }
 0x922   :  { %v1862_v23 = vadd.f32 %v1861_v31, %v1860_v27 }
 0x924   :  { %v1863_v35 = vmul.f32 %v1862_v23, %v2886_v10  ;;  %v1888_v40 = vcombine.low %v1862_v23, %v1862_v23 }
 0x926   :  { %v1866_v44 = vadd.f32 %v1864_v39, %v1863_v35  ;;  %v1895_v51 = vrot.slane %v1888_v40, %v2870_v60 }
 0x928   :  { %v1944_v52 = vmul.f32 -1.442695, %v1866_v44  ;;  %v1896_v53 = vcombine.low %v1895_v51, %v1895_v51 }
 0x92a   :  { %2590 = vpow2.f32 %v1944_v52  ;;  %1898 = vst [vmem:[#allocation7 + $0x18] sm:$0xc0] %v1896_v53 }
 0x92b   :  { %2592 = vtanh.f32 %v1862_v23 }
 0x934   :  { %v2591_v57 = vpop.eup %2590 }
 0x935   :  { %v1870_v63 = vadd.f32 1.0, %v2591_v57  ;;  %v2593_v1 = vpop.eup %2592 }
 0x937   :  { %2594 = vrcp.f32 %v1870_v63 }
 0x941   :  { %v2595_v2 = vpop.eup %2594 }
 0x942   :  { %v1874_v7 = vmul.f32 %v2595_v2, %v2593_v1 }
 0x944   :  { %v1876_v16 = vcombine.low %v1874_v7, %v1874_v7 }
 0x946   :  { %v1883_v10 = vrot.slane %v1876_v16, %v2870_v60 }
 0x948   :  { %v1884_v19 = vcombine.low %v1883_v10, %v1883_v10 }
 0x94a   :  { %1886 = vst [vmem:[#allocation7 + $0x10] sm:$0xc0] %v1884_v19 }
 0x94b   :  { %2651 = shalt.err (!%p2648_p6)
}
 0x94c   :  { %s2652_s27 = scalar_lea.hbm %s3202_s5, 512 }
 0x94d   :  { %p2653_p7 = scmp.ne.s32.totalorder %s3202_s5, %s2652_s27  ;;  %p2656_p8 = scmp.lt.u32.totalorder %s2652_s27, %s3202_s5 }
 0x94f   :  { %p2658_p9 = pnand %p2656_p8, %p2653_p7 }
 0x951   :  { %2661 = shalt.err (!%p2658_p9)
}
 0x952   :  { %s2677_s7 = smov 256   ;;  %s2678_s8 = smov 16  }
 0x953   :  { %1910 = dma.vmem_to_hbm [thread:$0]  %s1905_s4, 512, %s3202_s5, [#allocation4], %s2677_s7, %s2677_s7, %s2678_s8  }
 0x954   :  { %2666 = dma.done.wait [#allocation4], 512  }
 0x955   :  { %2667 = vsyncadd [#allocation4], 4294966784 }
 0x956   :  { %1914 = vsyncpa [#allocation3], 1 }
 0x957   :  { %1915 = vsyncpa [#allocation6], 1 }
 0x958   :  { %1916 = vsyncpa [#allocation4], 1 }

</bundles_post_ra>
